<compile_context>
chip_gen: v7x
topology: tpu7x:2x2x1
jax: 0.10.0
libtpu: 0.0.40
codegen_flags: <defaults>
</compile_context>

<pallas_src>
import functools

import jax
import jax.numpy as jnp
from jax import lax
from jax.experimental import pallas as pl
from jax.experimental.pallas import tpu as pltpu


# --------------------------------------------------------------------------
# shared kernel helpers
# --------------------------------------------------------------------------
def _masked_log_softmax_store(p, o_ref, num_classes):
    """log_softmax over the first `num_classes` lanes of p; lane-dense store."""
    lane = lax.broadcasted_iota(jnp.int32, p.shape, 1)
    valid = lane < num_classes
    pm = jnp.where(valid, p, -1e30)                     # finite, no inf math
    m = jnp.max(pm, axis=1, keepdims=True)
    e = jnp.exp(pm - m)                                 # padded lanes -> 0.0
    lse = jnp.log(jnp.sum(e, axis=1, keepdims=True))
    o_ref[...] = ((p - m) - lse).astype(o_ref.dtype)    # unmasked [*,128k] vst


# --------------------------------------------------------------------------
# small-N path: everything VMEM-resident, single grid=() call
# --------------------------------------------------------------------------
def _appnp_resident_kernel(x_ref, w1_ref, b1_ref, w2_ref, b2_ref, a_ref, o_ref,
                           *, K: int, alpha: float, num_classes: int,
                           half: int):
    # MLP: relu(x @ W1 + b1) @ W2 + b2  (class dim zero-padded to 128 lanes)
    h = jnp.dot(x_ref[...], w1_ref[...], preferred_element_type=jnp.float32)
    h = jnp.maximum(h + b1_ref[...], 0.0)
    z = jnp.dot(h, w2_ref[...], preferred_element_type=jnp.float32)
    z = z + b2_ref[...]

    # APPNP propagation.  (1-alpha) is pre-folded into a_ref in the wrapper.
    az = alpha * z
    a_top = a_ref[:half, :]            # bf16, static slices (no copies)
    a_bot = a_ref[half:, :]
    az_top = az[:half, :]
    az_bot = az[half:, :]

    def body(_, p):
        pb = p.astype(jnp.bfloat16)
        # two independent dots per step -> two MXU results in flight
        top = jnp.dot(a_top, pb, preferred_element_type=jnp.float32) + az_top
        bot = jnp.dot(a_bot, pb, preferred_element_type=jnp.float32) + az_bot
        return jnp.concatenate([top, bot], axis=0)

    p = lax.fori_loop(0, K, body, z, unroll=True)       # K static -> unrolled

    _masked_log_softmax_store(p, o_ref, num_classes)


# --------------------------------------------------------------------------
# large-N path, stage (a): row-tiled MLP producing z
# --------------------------------------------------------------------------
def _mlp_kernel(x_ref, w1_ref, b1_ref, w2_ref, b2_ref, z_ref):
    h = jnp.dot(x_ref[...], w1_ref[...], preferred_element_type=jnp.float32)
    h = jnp.maximum(h + b1_ref[...], 0.0)
    z = jnp.dot(h, w2_ref[...], preferred_element_type=jnp.float32)
    z_ref[...] = (z + b2_ref[...]).astype(z_ref.dtype)


# --------------------------------------------------------------------------
# large-N path, stage (b): propagation with streamed A row tiles, p resident
# in ping-pong VMEM scratch, fused masked log_softmax on the last k.
# --------------------------------------------------------------------------
def _appnp_prop_kernel(a_ref, z_ref, o_ref, p_scr,
                       *, K: int, alpha: float, num_classes: int, tm: int):
    k = pl.program_id(0)
    i = pl.program_id(1)
    row0 = pl.multiple_of(i * tm, tm)
    rows = pl.ds(row0, tm)

    # p_0 = z (copied once, before any tile of step 0 is computed)
    @pl.when(jnp.logical_and(k == 0, i == 0))
    def _():
        p_scr[0] = z_ref[...]

    az_tile = alpha * z_ref[rows, :]
    a_tile = a_ref[...]                              # (tm, N_pad) bf16 row tile

    def _step(src, dst):                             # static slots
        p_prev = p_scr[src].astype(jnp.bfloat16)     # full [N_pad, 128k]
        new_tile = jnp.dot(a_tile, p_prev,
                           preferred_element_type=jnp.float32) + az_tile
        p_scr[dst, rows, :] = new_tile

    @pl.when(k % 2 == 0)
    def _():
        _step(0, 1)

    @pl.when(k % 2 == 1)
    def _():
        _step(1, 0)

    @pl.when(k == K - 1)
    def _():
        p_tile = p_scr[K % 2, rows, :]               # static slot, dynamic rows
        _masked_log_softmax_store(p_tile, o_ref, num_classes)


# --------------------------------------------------------------------------
# wrapper glue (plain JAX)
# --------------------------------------------------------------------------
def _round_up(v, m):
    return ((v + m - 1) // m) * m


def _vmem_capacity_bytes():
    try:
        cap = getattr(pltpu.get_tpu_info(), "vmem_capacity_bytes", None)
        if cap:
            return int(cap)
    except Exception:
        pass
    return 64 * 1024 * 1024          # conservative (v7x per-core VMEM)


def _build_scaled_adjacency(edge_index, n, alpha):
    """bf16  (1-alpha) * D^{-1/2} (A + I) D^{-1/2}, duplicates summed,
    self-loops added only where missing (PyG gcn_norm semantics)."""
    src, dst = edge_index[0], edge_index[1]
    adj = jnp.zeros((n, n), jnp.float32).at[dst, src].add(1.0)   # scatter-add
    diag = jnp.diagonal(adj)
    adj = adj + jnp.diag(jnp.where(diag > 0.0, 0.0, 1.0))        # missing loops
    deg = jnp.sum(adj, axis=1)
    dinv = jnp.where(deg > 0.0, lax.rsqrt(deg), 0.0)
    dinv = dinv * jnp.sqrt(1.0 - alpha)              # fold (1-alpha) into norm
    return (adj * dinv[:, None] * dinv[None, :]).astype(jnp.bfloat16)


def appnp_forward(x, edge_index, w1, b1, w2, b2, *, K=10, alpha=0.1,
                  force_tiled=False):
    """x: [N, F_in] f32, edge_index: [2, E] int32 (src, dst). Returns [N, C]."""
    n, f_in = x.shape
    hid = w1.shape[1]
    num_classes = w2.shape[1]
    c_pad = max(128, _round_up(num_classes, 128))
    n_pad = _round_up(n, 128)

    a_s = _build_scaled_adjacency(edge_index, n, alpha)
    a_pad = jnp.zeros((n_pad, n_pad), jnp.bfloat16).at[:n, :n].set(a_s)
    x_pad = jnp.zeros((n_pad, f_in), jnp.float32).at[:n, :].set(
        x.astype(jnp.float32))
    w1f = w1.astype(jnp.float32)
    b1_2d = b1.astype(jnp.float32).reshape(1, hid)
    w2_p = jnp.zeros((hid, c_pad), jnp.float32).at[:, :num_classes].set(
        w2.astype(jnp.float32))
    b2_p = jnp.zeros((1, c_pad), jnp.float32).at[:, :num_classes].set(
        b2.astype(jnp.float32))

    vmem_cap = _vmem_capacity_bytes()
    est_resident = (n_pad * n_pad * 2                  # A_hat bf16
                    + n_pad * f_in * 4                 # x
                    + f_in * hid * 4 + hid * c_pad * 4 # weights
                    + 6 * n_pad * c_pad * 4)           # z / az / p temporaries
    use_resident = (not force_tiled) and est_resident <= 0.4 * vmem_cap
    if K == 0:
        use_resident = True

    # ---------------- small/medium N: fully VMEM-resident ------------------
    if use_resident:
        kernel = functools.partial(
            _appnp_resident_kernel, K=int(K), alpha=float(alpha),
            num_classes=int(num_classes), half=n_pad // 2)
        full = lambda shape: pl.BlockSpec(shape, lambda: (0,) * len(shape))
        cp = None
        if est_resident * 1.5 > 12 * 1024 * 1024:      # above default scoped limit
            cp = pltpu.CompilerParams(vmem_limit_bytes=int(est_resident * 1.5))
        out_padded = pl.pallas_call(
            kernel,
            out_shape=jax.ShapeDtypeStruct((n_pad, c_pad), jnp.float32),
            grid_spec=pltpu.PrefetchScalarGridSpec(
                num_scalar_prefetch=0,
                grid=(),
                in_specs=[full(x_pad.shape), full(w1f.shape), full(b1_2d.shape),
                          full(w2_p.shape), full(b2_p.shape), full(a_pad.shape)],
                out_specs=full((n_pad, c_pad))),
            compiler_params=cp,
        )(x_pad, w1f, b1_2d, w2_p, b2_p, a_pad)
        return out_padded[:n, :num_classes]

    # ---------------- large N: row-tiled / streamed path -------------------
    tm = 128
    for cand in (512, 256):
        tile_bytes = (2 * cand * n_pad * 2 + 3 * n_pad * c_pad * 4
                      + n_pad * c_pad * 2 + 4 * cand * c_pad * 4)
        if n_pad % cand == 0 and tile_bytes <= 0.45 * vmem_cap:
            tm = cand
            break
    t = n_pad // tm

    # (a) row-tiled MLP producing z  (row axis "parallel" -> v7x megacore)
    z = pl.pallas_call(
        _mlp_kernel,
        out_shape=jax.ShapeDtypeStruct((n_pad, c_pad), jnp.float32),
        grid_spec=pltpu.PrefetchScalarGridSpec(
            num_scalar_prefetch=0,
            grid=(t,),
            in_specs=[
                pl.BlockSpec((tm, f_in), lambda i: (i, 0)),
                pl.BlockSpec((f_in, hid), lambda i: (0, 0)),
                pl.BlockSpec((1, hid), lambda i: (0, 0)),
                pl.BlockSpec((hid, c_pad), lambda i: (0, 0)),
                pl.BlockSpec((1, c_pad), lambda i: (0, 0)),
            ],
            out_specs=pl.BlockSpec((tm, c_pad), lambda i: (i, 0))),
        compiler_params=pltpu.CompilerParams(
            dimension_semantics=("parallel",)),
    )(x_pad, w1f, b1_2d, w2_p, b2_p)

    # (b) propagation + masked log_softmax: A row tiles streamed (bf16,
    #     double-buffered by BlockSpec), p resident in ping-pong VMEM scratch.
    prop_tile_bytes = (2 * tm * n_pad * 2 + 3 * n_pad * c_pad * 4
                       + n_pad * c_pad * 2 + 4 * tm * c_pad * 4)
    cp_kwargs = dict(dimension_semantics=("arbitrary", "arbitrary"))
    if prop_tile_bytes * 1.4 > 12 * 1024 * 1024:
        cp_kwargs["vmem_limit_bytes"] = int(prop_tile_bytes * 1.4)
    prop_kernel = functools.partial(
        _appnp_prop_kernel, K=int(K), alpha=float(alpha),
        num_classes=int(num_classes), tm=tm)
    out_padded = pl.pallas_call(
        prop_kernel,
        out_shape=jax.ShapeDtypeStruct((n_pad, c_pad), jnp.float32),
        grid_spec=pltpu.PrefetchScalarGridSpec(
            num_scalar_prefetch=0,
            grid=(int(K), t),
            in_specs=[
                pl.BlockSpec((tm, n_pad), lambda k, i: (i, 0)),    # A row tile
                pl.BlockSpec((n_pad, c_pad), lambda k, i: (0, 0)), # z resident
            ],
            out_specs=pl.BlockSpec((tm, c_pad), lambda k, i: (i, 0)),
            scratch_shapes=[pltpu.VMEM((2, n_pad, c_pad), jnp.float32)]),
        compiler_params=pltpu.CompilerParams(**cp_kwargs),
    )(a_pad, z)
    return out_padded[:n, :num_classes]


# --------------------------------------------------------------------------
# pure-JAX reference (mirrors the declared bf16-A precision policy)
# --------------------------------------------------------------------------
def _ref_forward(x, edge_index, w1, b1, w2, b2, *, K, alpha):
    n = x.shape[0]
    a_s = _build_scaled_adjacency(edge_index, n, alpha)     # bf16, (1-a) folded
    h = jnp.maximum(x @ w1 + b1, 0.0)
    z = h @ w2 + b2
    p = z
    for _ in range(K):
        p = jnp.dot(a_s, p.astype(jnp.bfloat16),
                    preferred_element_type=jnp.float32) + alpha * z
    return jax.nn.log_softmax(p, axis=1)


if __name__ == "__main__":
    key = jax.random.PRNGKey(0)

    def make_inputs(k, n, e, f_in, hid, c):
        kx, ke, k1, k2, k3, k4 = jax.random.split(k, 6)
        x = jax.random.normal(kx, (n, f_in), jnp.float32)
        edge_index = jax.random.randint(ke, (2, e), 0, n, jnp.int32)
        w1 = jax.random.normal(k1, (f_in, hid), jnp.float32) / jnp.sqrt(f_in)
        b1 = jax.random.normal(k2, (hid,), jnp.float32) * 0.01
        w2 = jax.random.normal(k3, (hid, c), jnp.float32) / jnp.sqrt(hid)
        b2 = jax.random.normal(k4, (c,), jnp.float32) * 0.01
        return x, edge_index, w1, b1, w2, b2

    ka, kb = jax.random.split(key)

    # Case 1: small N -> VMEM-resident single-shot kernel (N padded to 128).
    args1 = make_inputs(ka, 64, 256, 128, 128, 8)
    out1 = jax.block_until_ready(appnp_forward(*args1, K=10, alpha=0.1))
    ref1 = _ref_forward(*args1, K=10, alpha=0.1)
    assert out1.shape == (64, 8)
    assert jnp.allclose(out1, ref1, atol=2e-3, rtol=2e-3), "resident mismatch"

    # Case 2: force the row-tiled / streamed path (grid=(K, N_pad//TM), TM=128).
    args2 = make_inputs(kb, 300, 1200, 128, 128, 7)
    out2 = jax.block_until_ready(
        appnp_forward(*args2, K=4, alpha=0.2, force_tiled=True))
    ref2 = _ref_forward(*args2, K=4, alpha=0.2)
    assert out2.shape == (300, 7)
    assert jnp.allclose(out2, ref2, atol=2e-3, rtol=2e-3), "tiled mismatch"

    print("KERNEL_OK")
</pallas_src>

<mosaic_0001>
module attributes {stable_mosaic.version = 11 : i64} {
  func.func @_appnp_resident_kernel(%arg0: memref<128x128xf32, #tpu.memory_space<vmem>>, %arg1: memref<128x128xf32, #tpu.memory_space<vmem>>, %arg2: memref<1x128xf32, #tpu.memory_space<vmem>>, %arg3: memref<128x128xf32, #tpu.memory_space<vmem>>, %arg4: memref<1x128xf32, #tpu.memory_space<vmem>>, %arg5: memref<128x128xbf16, #tpu.memory_space<vmem>>, %arg6: memref<128x128xf32, #tpu.memory_space<vmem>>) attributes {dimension_semantics = [], scalar_prefetch = 0 : i64, scratch_operands = 0 : i64, tpu.core_type = #tpu.core_type<tc>} {
    %c0 = arith.constant 0 : index
    %c0_0 = arith.constant 0 : index
    %0 = vector.load %arg0[%c0, %c0_0] : memref<128x128xf32, #tpu.memory_space<vmem>>, vector<128x128xf32>
    %c0_1 = arith.constant 0 : index
    %c0_2 = arith.constant 0 : index
    %1 = vector.load %arg1[%c0_1, %c0_2] : memref<128x128xf32, #tpu.memory_space<vmem>>, vector<128x128xf32>
    %cst = arith.constant dense<0.000000e+00> : vector<128x128xf32>
    %2 = tpu.matmul %0, %1, %cst {dimension_numbers = #tpu.dot_dimension_numbers<[1], [0], [0], [1], [0, 0, 1, 1], [], []>} : vector<128x128xf32>, vector<128x128xf32>, vector<128x128xf32> -> vector<128x128xf32>
    %c0_3 = arith.constant 0 : index
    %c0_4 = arith.constant 0 : index
    %3 = vector.load %arg2[%c0_3, %c0_4] : memref<1x128xf32, #tpu.memory_space<vmem>>, vector<1x128xf32>
    %4 = vector.broadcast %3 : vector<1x128xf32> to vector<128x128xf32>
    %5 = arith.addf %2, %4 : vector<128x128xf32>
    %cst_5 = arith.constant 0.000000e+00 : f32
    %6 = vector.broadcast %cst_5 : f32 to vector<128x128xf32>
    %7 = arith.maximumf %5, %6 : vector<128x128xf32>
    %c0_6 = arith.constant 0 : index
    %c0_7 = arith.constant 0 : index
    %8 = vector.load %arg3[%c0_6, %c0_7] : memref<128x128xf32, #tpu.memory_space<vmem>>, vector<128x128xf32>
    %cst_8 = arith.constant dense<0.000000e+00> : vector<128x128xf32>
    %9 = tpu.matmul %7, %8, %cst_8 {dimension_numbers = #tpu.dot_dimension_numbers<[1], [0], [0], [1], [0, 0, 1, 1], [], []>} : vector<128x128xf32>, vector<128x128xf32>, vector<128x128xf32> -> vector<128x128xf32>
    %c0_9 = arith.constant 0 : index
    %c0_10 = arith.constant 0 : index
    %10 = vector.load %arg4[%c0_9, %c0_10] : memref<1x128xf32, #tpu.memory_space<vmem>>, vector<1x128xf32>
    %11 = vector.broadcast %10 : vector<1x128xf32> to vector<128x128xf32>
    %12 = arith.addf %9, %11 : vector<128x128xf32>
    %cst_11 = arith.constant 1.000000e-01 : f32
    %13 = vector.broadcast %cst_11 : f32 to vector<128x128xf32>
    %14 = arith.mulf %13, %12 : vector<128x128xf32>
    %c0_12 = arith.constant 0 : index
    %c0_13 = arith.constant 0 : index
    %15 = vector.load %arg5[%c0_12, %c0_13] : memref<128x128xbf16, #tpu.memory_space<vmem>>, vector<64x128xbf16>
    %c64 = arith.constant 64 : index
    %c0_14 = arith.constant 0 : index
    %16 = vector.load %arg5[%c64, %c0_14] : memref<128x128xbf16, #tpu.memory_space<vmem>>, vector<64x128xbf16>
    %17 = vector.extract_strided_slice %14 {offsets = [0, 0], sizes = [64, 128], strides = [1, 1]} : vector<128x128xf32> to vector<64x128xf32>
    %18 = vector.extract_strided_slice %14 {offsets = [64, 0], sizes = [64, 128], strides = [1, 1]} : vector<128x128xf32> to vector<64x128xf32>
    %c0_i32 = arith.constant 0 : i32
    %19 = arith.truncf %12 : vector<128x128xf32> to vector<128x128xbf16>
    %cst_15 = arith.constant dense<0.000000e+00> : vector<64x128xf32>
    %20 = tpu.matmul %15, %19, %cst_15 {dimension_numbers = #tpu.dot_dimension_numbers<[1], [0], [0], [1], [0, 0, 1, 1], [], []>} : vector<64x128xbf16>, vector<128x128xbf16>, vector<64x128xf32> -> vector<64x128xf32>
    %21 = arith.addf %20, %17 : vector<64x128xf32>
    %cst_16 = arith.constant dense<0.000000e+00> : vector<64x128xf32>
    %22 = tpu.matmul %16, %19, %cst_16 {dimension_numbers = #tpu.dot_dimension_numbers<[1], [0], [0], [1], [0, 0, 1, 1], [], []>} : vector<64x128xbf16>, vector<128x128xbf16>, vector<64x128xf32> -> vector<64x128xf32>
    %23 = arith.addf %22, %18 : vector<64x128xf32>
    %24 = tpu.concatenate %21, %23 in 0 : vector<64x128xf32>, vector<64x128xf32> -> vector<128x128xf32>
    %c1_i32 = arith.constant 1 : i32
    %25 = arith.truncf %24 : vector<128x128xf32> to vector<128x128xbf16>
    %cst_17 = arith.constant dense<0.000000e+00> : vector<64x128xf32>
    %26 = tpu.matmul %15, %25, %cst_17 {dimension_numbers = #tpu.dot_dimension_numbers<[1], [0], [0], [1], [0, 0, 1, 1], [], []>} : vector<64x128xbf16>, vector<128x128xbf16>, vector<64x128xf32> -> vector<64x128xf32>
    %27 = arith.addf %26, %17 : vector<64x128xf32>
    %cst_18 = arith.constant dense<0.000000e+00> : vector<64x128xf32>
    %28 = tpu.matmul %16, %25, %cst_18 {dimension_numbers = #tpu.dot_dimension_numbers<[1], [0], [0], [1], [0, 0, 1, 1], [], []>} : vector<64x128xbf16>, vector<128x128xbf16>, vector<64x128xf32> -> vector<64x128xf32>
    %29 = arith.addf %28, %18 : vector<64x128xf32>
    %30 = tpu.concatenate %27, %29 in 0 : vector<64x128xf32>, vector<64x128xf32> -> vector<128x128xf32>
    %c2_i32 = arith.constant 2 : i32
    %31 = arith.truncf %30 : vector<128x128xf32> to vector<128x128xbf16>
    %cst_19 = arith.constant dense<0.000000e+00> : vector<64x128xf32>
    %32 = tpu.matmul %15, %31, %cst_19 {dimension_numbers = #tpu.dot_dimension_numbers<[1], [0], [0], [1], [0, 0, 1, 1], [], []>} : vector<64x128xbf16>, vector<128x128xbf16>, vector<64x128xf32> -> vector<64x128xf32>
    %33 = arith.addf %32, %17 : vector<64x128xf32>
    %cst_20 = arith.constant dense<0.000000e+00> : vector<64x128xf32>
    %34 = tpu.matmul %16, %31, %cst_20 {dimension_numbers = #tpu.dot_dimension_numbers<[1], [0], [0], [1], [0, 0, 1, 1], [], []>} : vector<64x128xbf16>, vector<128x128xbf16>, vector<64x128xf32> -> vector<64x128xf32>
    %35 = arith.addf %34, %18 : vector<64x128xf32>
    %36 = tpu.concatenate %33, %35 in 0 : vector<64x128xf32>, vector<64x128xf32> -> vector<128x128xf32>
    %c3_i32 = arith.constant 3 : i32
    %37 = arith.truncf %36 : vector<128x128xf32> to vector<128x128xbf16>
    %cst_21 = arith.constant dense<0.000000e+00> : vector<64x128xf32>
    %38 = tpu.matmul %15, %37, %cst_21 {dimension_numbers = #tpu.dot_dimension_numbers<[1], [0], [0], [1], [0, 0, 1, 1], [], []>} : vector<64x128xbf16>, vector<128x128xbf16>, vector<64x128xf32> -> vector<64x128xf32>
    %39 = arith.addf %38, %17 : vector<64x128xf32>
    %cst_22 = arith.constant dense<0.000000e+00> : vector<64x128xf32>
    %40 = tpu.matmul %16, %37, %cst_22 {dimension_numbers = #tpu.dot_dimension_numbers<[1], [0], [0], [1], [0, 0, 1, 1], [], []>} : vector<64x128xbf16>, vector<128x128xbf16>, vector<64x128xf32> -> vector<64x128xf32>
    %41 = arith.addf %40, %18 : vector<64x128xf32>
    %42 = tpu.concatenate %39, %41 in 0 : vector<64x128xf32>, vector<64x128xf32> -> vector<128x128xf32>
    %c4_i32 = arith.constant 4 : i32
    %43 = arith.truncf %42 : vector<128x128xf32> to vector<128x128xbf16>
    %cst_23 = arith.constant dense<0.000000e+00> : vector<64x128xf32>
    %44 = tpu.matmul %15, %43, %cst_23 {dimension_numbers = #tpu.dot_dimension_numbers<[1], [0], [0], [1], [0, 0, 1, 1], [], []>} : vector<64x128xbf16>, vector<128x128xbf16>, vector<64x128xf32> -> vector<64x128xf32>
    %45 = arith.addf %44, %17 : vector<64x128xf32>
    %cst_24 = arith.constant dense<0.000000e+00> : vector<64x128xf32>
    %46 = tpu.matmul %16, %43, %cst_24 {dimension_numbers = #tpu.dot_dimension_numbers<[1], [0], [0], [1], [0, 0, 1, 1], [], []>} : vector<64x128xbf16>, vector<128x128xbf16>, vector<64x128xf32> -> vector<64x128xf32>
    %47 = arith.addf %46, %18 : vector<64x128xf32>
    %48 = tpu.concatenate %45, %47 in 0 : vector<64x128xf32>, vector<64x128xf32> -> vector<128x128xf32>
    %c5_i32 = arith.constant 5 : i32
    %49 = arith.truncf %48 : vector<128x128xf32> to vector<128x128xbf16>
    %cst_25 = arith.constant dense<0.000000e+00> : vector<64x128xf32>
    %50 = tpu.matmul %15, %49, %cst_25 {dimension_numbers = #tpu.dot_dimension_numbers<[1], [0], [0], [1], [0, 0, 1, 1], [], []>} : vector<64x128xbf16>, vector<128x128xbf16>, vector<64x128xf32> -> vector<64x128xf32>
    %51 = arith.addf %50, %17 : vector<64x128xf32>
    %cst_26 = arith.constant dense<0.000000e+00> : vector<64x128xf32>
    %52 = tpu.matmul %16, %49, %cst_26 {dimension_numbers = #tpu.dot_dimension_numbers<[1], [0], [0], [1], [0, 0, 1, 1], [], []>} : vector<64x128xbf16>, vector<128x128xbf16>, vector<64x128xf32> -> vector<64x128xf32>
    %53 = arith.addf %52, %18 : vector<64x128xf32>
    %54 = tpu.concatenate %51, %53 in 0 : vector<64x128xf32>, vector<64x128xf32> -> vector<128x128xf32>
    %c6_i32 = arith.constant 6 : i32
    %55 = arith.truncf %54 : vector<128x128xf32> to vector<128x128xbf16>
    %cst_27 = arith.constant dense<0.000000e+00> : vector<64x128xf32>
    %56 = tpu.matmul %15, %55, %cst_27 {dimension_numbers = #tpu.dot_dimension_numbers<[1], [0], [0], [1], [0, 0, 1, 1], [], []>} : vector<64x128xbf16>, vector<128x128xbf16>, vector<64x128xf32> -> vector<64x128xf32>
    %57 = arith.addf %56, %17 : vector<64x128xf32>
    %cst_28 = arith.constant dense<0.000000e+00> : vector<64x128xf32>
    %58 = tpu.matmul %16, %55, %cst_28 {dimension_numbers = #tpu.dot_dimension_numbers<[1], [0], [0], [1], [0, 0, 1, 1], [], []>} : vector<64x128xbf16>, vector<128x128xbf16>, vector<64x128xf32> -> vector<64x128xf32>
    %59 = arith.addf %58, %18 : vector<64x128xf32>
    %60 = tpu.concatenate %57, %59 in 0 : vector<64x128xf32>, vector<64x128xf32> -> vector<128x128xf32>
    %c7_i32 = arith.constant 7 : i32
    %61 = arith.truncf %60 : vector<128x128xf32> to vector<128x128xbf16>
    %cst_29 = arith.constant dense<0.000000e+00> : vector<64x128xf32>
    %62 = tpu.matmul %15, %61, %cst_29 {dimension_numbers = #tpu.dot_dimension_numbers<[1], [0], [0], [1], [0, 0, 1, 1], [], []>} : vector<64x128xbf16>, vector<128x128xbf16>, vector<64x128xf32> -> vector<64x128xf32>
    %63 = arith.addf %62, %17 : vector<64x128xf32>
    %cst_30 = arith.constant dense<0.000000e+00> : vector<64x128xf32>
    %64 = tpu.matmul %16, %61, %cst_30 {dimension_numbers = #tpu.dot_dimension_numbers<[1], [0], [0], [1], [0, 0, 1, 1], [], []>} : vector<64x128xbf16>, vector<128x128xbf16>, vector<64x128xf32> -> vector<64x128xf32>
    %65 = arith.addf %64, %18 : vector<64x128xf32>
    %66 = tpu.concatenate %63, %65 in 0 : vector<64x128xf32>, vector<64x128xf32> -> vector<128x128xf32>
    %c8_i32 = arith.constant 8 : i32
    %67 = arith.truncf %66 : vector<128x128xf32> to vector<128x128xbf16>
    %cst_31 = arith.constant dense<0.000000e+00> : vector<64x128xf32>
    %68 = tpu.matmul %15, %67, %cst_31 {dimension_numbers = #tpu.dot_dimension_numbers<[1], [0], [0], [1], [0, 0, 1, 1], [], []>} : vector<64x128xbf16>, vector<128x128xbf16>, vector<64x128xf32> -> vector<64x128xf32>
    %69 = arith.addf %68, %17 : vector<64x128xf32>
    %cst_32 = arith.constant dense<0.000000e+00> : vector<64x128xf32>
    %70 = tpu.matmul %16, %67, %cst_32 {dimension_numbers = #tpu.dot_dimension_numbers<[1], [0], [0], [1], [0, 0, 1, 1], [], []>} : vector<64x128xbf16>, vector<128x128xbf16>, vector<64x128xf32> -> vector<64x128xf32>
    %71 = arith.addf %70, %18 : vector<64x128xf32>
    %72 = tpu.concatenate %69, %71 in 0 : vector<64x128xf32>, vector<64x128xf32> -> vector<128x128xf32>
    %c9_i32 = arith.constant 9 : i32
    %73 = arith.truncf %72 : vector<128x128xf32> to vector<128x128xbf16>
    %cst_33 = arith.constant dense<0.000000e+00> : vector<64x128xf32>
    %74 = tpu.matmul %15, %73, %cst_33 {dimension_numbers = #tpu.dot_dimension_numbers<[1], [0], [0], [1], [0, 0, 1, 1], [], []>} : vector<64x128xbf16>, vector<128x128xbf16>, vector<64x128xf32> -> vector<64x128xf32>
    %75 = arith.addf %74, %17 : vector<64x128xf32>
    %cst_34 = arith.constant dense<0.000000e+00> : vector<64x128xf32>
    %76 = tpu.matmul %16, %73, %cst_34 {dimension_numbers = #tpu.dot_dimension_numbers<[1], [0], [0], [1], [0, 0, 1, 1], [], []>} : vector<64x128xbf16>, vector<128x128xbf16>, vector<64x128xf32> -> vector<64x128xf32>
    %77 = arith.addf %76, %18 : vector<64x128xf32>
    %78 = tpu.concatenate %75, %77 in 0 : vector<64x128xf32>, vector<64x128xf32> -> vector<128x128xf32>
    %79 = tpu.iota {dimensions = array<i32: 1>} : vector<128x128xi32>
    %c8_i32_35 = arith.constant 8 : i32
    %80 = vector.broadcast %c8_i32_35 : i32 to vector<128x128xi32>
    %81 = arith.cmpi slt, %79, %80 : vector<128x128xi32>
    %cst_36 = arith.constant -1.000000e+30 : f32
    %82 = vector.broadcast %cst_36 : f32 to vector<128x128xf32>
    %83 = arith.select %81, %78, %82 : vector<128x128xi1>, vector<128x128xf32>
    %cst_37 = arith.constant dense<0xFF800000> : vector<128xf32>
    %84 = vector.multi_reduction <maximumf>, %83, %cst_37 [1] : vector<128x128xf32> to vector<128xf32>
    %85 = vector.shape_cast %84 : vector<128xf32> to vector<128x1xf32>
    %86 = vector.broadcast %85 : vector<128x1xf32> to vector<128x128xf32>
    %87 = arith.subf %83, %86 : vector<128x128xf32>
    %88 = math.exp %87 : vector<128x128xf32>
    %cst_38 = arith.constant dense<0.000000e+00> : vector<128xf32>
    %89 = vector.multi_reduction <add>, %88, %cst_38 [1] : vector<128x128xf32> to vector<128xf32>
    %90 = vector.shape_cast %89 : vector<128xf32> to vector<128x1xf32>
    %91 = math.log %90 : vector<128x1xf32>
    %92 = vector.broadcast %85 : vector<128x1xf32> to vector<128x128xf32>
    %93 = arith.subf %78, %92 : vector<128x128xf32>
    %94 = vector.broadcast %91 : vector<128x1xf32> to vector<128x128xf32>
    %95 = arith.subf %93, %94 : vector<128x128xf32>
    %c0_39 = arith.constant 0 : index
    %c0_40 = arith.constant 0 : index
    %96 = vector.load %arg6[%c0_39, %c0_40] : memref<128x128xf32, #tpu.memory_space<vmem>>, vector<128x128xf32>
    tpu.vector_store %arg6[%c0_39, %c0_40], %95 {strides = array<i32>} : memref<128x128xf32, #tpu.memory_space<vmem>>, vector<128x128xf32>,
    return
  }
}

</mosaic_0001>

<bundles_post_ra>
// kernel: tpu_custom_call.1
= control target key start
LH: loop header
LB: loop body
LE: loop exit
PB: predicated region body
PF: predicated region fallthrough
CT: control target
= control target key end

     0   :  { %11 = vsyncpa [#allocation3], 0  ;;  %s4008_s0 = inlined_call_operand.hbm [shape: f32[128,128], index: 0, kind: input, shape index: {}]   ;;  %s4009_s1 = inlined_call_operand.hbm [shape: f32[128,128], index: 1, kind: input, shape index: {}]   ;;  %s4010_s2 = inlined_call_operand.vmem [shape: f32[1,128], index: 2, kind: input, shape index: {}]   ;;  %s4011_s3 = inlined_call_operand.hbm [shape: f32[128,128], index: 3, kind: input, shape index: {}]   ;;  %s4012_s4 = inlined_call_operand.vmem [shape: f32[1,128], index: 4, kind: input, shape index: {}]   ;;  %s4013_s5 = inlined_call_operand.hbm [shape: bf16[128,128], index: 5, kind: input, shape index: {}]   ;;  %s4014_s6 = inlined_call_operand.hbm [shape: f32[128,128], index: 6, kind: output, shape index: {}]  }
   0x1   :  { %12 = vsyncpa [#allocation6], 0 }
   0x2   :  { %13 = vsyncpa [#allocation9], 0 }
   0x3   :  { %14 = vsyncpa [#allocation4], 0  ;;  %s3315_s21 = smov [#allocation5]   ;;  %s3316_s23 = smov [#allocation2]  }
   0x4   :  { %s32_s22 = sshll.u32 %s3315_s21, 4  ;;  %s20_s24 = sshll.u32 %s3316_s23, 4  ;;  %s33_s22 = int_to_ptr.vmem [resolvable:$true] %s32_s22  ;;  %s3359_s24 = int_to_ptr.vmem [resolvable:$true] %s20_s24 }
   0x5   :  { %s3197_s27 = scalar_lea.hbm %s4009_s1, 2048 }
   0x6   :  { %p3198_p0 = scmp.ne.s32.totalorder %s4009_s1, %s3197_s27  ;;  %p3201_p1 = scmp.lt.u32.totalorder %s3197_s27, %s4009_s1 }
   0x8   :  { %p3203_p2 = pnand %p3201_p1, %p3198_p0 }
   0xa   :  { %3206 = shalt.err (!%p3203_p2)
}
   0xb   :  { %s3207_s8 = scalar_lea.vmem %s33_s22, 2048  ;;  %p3212_p4 = scmp.lt.s32.totalorder %s33_s22, %s33_s22 }
   0xc   :  { %p3208_p3 = scmp.ne.s32.totalorder %s33_s22, %s3207_s8  ;;  %p3213_p5 = scmp.lt.s32.totalorder %s3207_s8, %s3207_s8 }
   0xe   :  { %p3214_p6 = por %p3213_p5, %p3212_p4 }
  0x10   :  { %p3215_p7 = pnand %p3214_p6, %p3208_p3 }
  0x12   :  { %3218 = shalt.err (!%p3215_p7)
}
  0x13   :  { %s3317_s9 = smov 128   ;;  %s3318_s10 = smov 8  }
  0x14   :  { %38 = dma.hbm_to_vmem [thread:$0]  %s4009_s1, 2048, %s33_s22, [#allocation6], %s3317_s9, %s3317_s9, %s3318_s10  }
  0x15   :  { %s3219_s15 = scalar_lea.hbm %s4008_s0, 2048 }
  0x16   :  { %p3220_p8 = scmp.ne.s32.totalorder %s4008_s0, %s3219_s15  ;;  %p3223_p9 = scmp.lt.u32.totalorder %s3219_s15, %s4008_s0 }
  0x18   :  { %p3225_p10 = pnand %p3223_p9, %p3220_p8 }
  0x1a   :  { %3228 = shalt.err (!%p3225_p10)
}
  0x1b   :  { %s3229_s20 = scalar_lea.vmem %s3359_s24, 2048  ;;  %p3234_p12 = scmp.lt.s32.totalorder %s3359_s24, %s3359_s24 }
  0x1c   :  { %p3230_p11 = scmp.ne.s32.totalorder %s3359_s24, %s3229_s20  ;;  %p3235_p13 = scmp.lt.s32.totalorder %s3229_s20, %s3229_s20 }
  0x1e   :  { %p3236_p0 = por %p3235_p13, %p3234_p12 }
  0x20   :  { %p3237_p1 = pnand %p3236_p0, %p3230_p11 }
  0x22   :  { %3240 = shalt.err (!%p3237_p1)
}
  0x23   :  { %26 = dma.hbm_to_vmem [thread:$0]  %s4008_s0, 2048, %s3359_s24, [#allocation3], %s3317_s9, %s3317_s9, %s3318_s10  }
  0x24   :  { %s3319_s22 = smov [#allocation7]   ;;  %s3320_s25 = smov [#allocation8]  }
  0x25   :  { %s46_s23 = sshll.u32 %s3319_s22, 4  ;;  %s60_s26 = sshll.u32 %s3320_s25, 4  ;;  %s47_s23 = int_to_ptr.vmem [resolvable:$true] %s46_s23  ;;  %s3396_s26 = int_to_ptr.vmem [resolvable:$true] %s60_s26 }
  0x26   :  { %s3241_s29 = scalar_lea.hbm %s4011_s3, 2048 }
  0x27   :  { %p3242_p2 = scmp.ne.s32.totalorder %s4011_s3, %s3241_s29  ;;  %p3245_p3 = scmp.lt.u32.totalorder %s3241_s29, %s4011_s3 }
  0x29   :  { %p3247_p4 = pnand %p3245_p3, %p3242_p2 }
  0x2b   :  { %3250 = shalt.err (!%p3247_p4)
}
  0x2c   :  { %s3251_s0 = scalar_lea.vmem %s47_s23, 2048  ;;  %p3256_p6 = scmp.lt.s32.totalorder %s47_s23, %s47_s23 }
  0x2d   :  { %p3252_p5 = scmp.ne.s32.totalorder %s47_s23, %s3251_s0  ;;  %p3257_p7 = scmp.lt.s32.totalorder %s3251_s0, %s3251_s0 }
  0x2f   :  { %p3258_p8 = por %p3257_p7, %p3256_p6 }
  0x31   :  { %p3259_p9 = pnand %p3258_p8, %p3252_p5 }
  0x33   :  { %3262 = shalt.err (!%p3259_p9)
}
  0x34   :  { %52 = dma.hbm_to_vmem [thread:$0]  %s4011_s3, 2048, %s47_s23, [#allocation6], %s3317_s9, %s3317_s9, %s3318_s10  }
  0x35   :  { %s3263_s15 = scalar_lea.hbm %s4013_s5, 1024 }
  0x36   :  { %p3264_p10 = scmp.ne.s32.totalorder %s4013_s5, %s3263_s15  ;;  %p3267_p11 = scmp.lt.u32.totalorder %s3263_s15, %s4013_s5 }
  0x38   :  { %p3269_p12 = pnand %p3267_p11, %p3264_p10 }
  0x3a   :  { %3272 = shalt.err (!%p3269_p12)
}
  0x3b   :  { %s3273_s20 = scalar_lea.vmem %s3396_s26, 1024  ;;  %p3278_p0 = scmp.lt.s32.totalorder %s3396_s26, %s3396_s26 }
  0x3c   :  { %p3274_p13 = scmp.ne.s32.totalorder %s3396_s26, %s3273_s20  ;;  %p3279_p1 = scmp.lt.s32.totalorder %s3273_s20, %s3273_s20 }
  0x3e   :  { %p3280_p2 = por %p3279_p1, %p3278_p0 }
  0x40   :  { %p3281_p3 = pnand %p3280_p2, %p3274_p13 }
  0x42   :  { %3284 = shalt.err (!%p3281_p3)
}
  0x43   :  { %s3321_s3 = smov 64   ;;  %s3322_s1 = smov 4  }
  0x44   :  { %66 = dma.hbm_to_vmem [thread:$0]  %s4013_s5, 1024, %s3396_s26, [#allocation9], %s3321_s3, %s3321_s3, %s3322_s1  }
  0x45   :  { %3307 = dma.done.wait [#allocation3], 2048  }
  0x46   :  { %3308 = vsyncadd [#allocation3], 4294965248 }
  0x47   :  { %3309 = dma.done.wait [#allocation6], 4096  }
  0x48   :  { %3310 = vsyncadd [#allocation6], 4294963200 }
  0x49   :  { %3311 = dma.done.wait [#allocation9], 1024  }
  0x4a   :  { %3312 = vsyncadd [#allocation9], 4294966272  ;;  %v96_v0 = vld [vmem:[#allocation5] sm:$0xff]  ;;  %v97_v1 = vld [vmem:[#allocation5 + $0x8] sm:$0xff] }
  0x4b   :  { %v98_v2 = vld [vmem:[#allocation5 + $0x10] sm:$0xff]  ;;  %v3044_v3 = vpack.c.bf16 %v97_v1, %v96_v0  ;;  %v99_v4 = vld [vmem:[#allocation5 + $0x18] sm:$0xff]  ;;  %v100_v6 = vld [vmem:[#allocation5 + $0x20] sm:$0xff] }
  0x4c   :  { %v3048_v5 = vpack.c.bf16 %v99_v4, %v98_v2  ;;  %v101_v7 = vld [vmem:[#allocation5 + $0x28] sm:$0xff]  ;;  %v80_v9 = vld [vmem:[#allocation2] sm:$0xff]  ;;  %v102_v10 = vld [vmem:[#allocation5 + $0x30] sm:$0xff] }
  0x4d   :  { %3045 = vmatprep.subr.bf16.mxu0 %v3044_v3  ;;  %v3052_v8 = vpack.c.bf16 %v101_v7, %v100_v6  ;;  %v103_v11 = vld [vmem:[#allocation5 + $0x38] sm:$0xff]  ;;  %2484 = vmatprep.mubr.f32.mxu0 %v80_v9  ;;  %v104_v13 = vld [vmem:[#allocation5 + $0x40] sm:$0xff]  ;;  %v105_v14 = vld [vmem:[#allocation5 + $0x48] sm:$0xff] }
  0x4e   :  { %3047 = vmatpush3.bf16.msra.mxu0 %v3044_v3  ;;  %v3056_v12 = vpack.c.bf16 %v103_v11, %v102_v10  ;;  %v280_v15 = vld [vmem:[#allocation7] sm:$0xff]  ;;  %v281_v16 = vld [vmem:[#allocation7 + $0x8] sm:$0xff]  ;;  %v282_v17 = vld [vmem:[#allocation7 + $0x10] sm:$0xff]  ;;  %v3060_v21 = vpack.c.bf16 %v105_v14, %v104_v13 }
  0x4f   :  { %3049 = vmatprep.subr.bf16.mxu0 %v3048_v5  ;;  %v283_v18 = vld [vmem:[#allocation7 + $0x18] sm:$0xff]  ;;  %v3076_v19 = vpack.c.bf16 %v281_v16, %v280_v15  ;;  %v284_v22 = vld [vmem:[#allocation7 + $0x20] sm:$0xff]  ;;  %v285_v23 = vld [vmem:[#allocation7 + $0x28] sm:$0xff] }
  0x50   :  { %v3080_v20 = vpack.c.bf16 %v283_v18, %v282_v17  ;;  %v106_v24 = vld [vmem:[#allocation5 + $0x50] sm:$0xff]  ;;  %v107_v25 = vld [vmem:[#allocation5 + $0x58] sm:$0xff]  ;;  %v108_v28 = vld [vmem:[#allocation5 + $0x60] sm:$0xff]  ;;  %v3084_v30 = vpack.c.bf16 %v285_v23, %v284_v22 }
  0x51   :  { %3077 = vmatprep.subr.bf16.mxu1 %v3076_v19  ;;  %v286_v26 = vld [vmem:[#allocation7 + $0x30] sm:$0xff]  ;;  %v287_v27 = vld [vmem:[#allocation7 + $0x38] sm:$0xff]  ;;  %v109_v29 = vld [vmem:[#allocation5 + $0x68] sm:$0xff]  ;;  %v3064_v31 = vpack.c.bf16 %v107_v25, %v106_v24 }
  0x52   :  { %3051 = vmatpush3.bf16.msra.mxu0 %v3048_v5  ;;  %3079 = vmatpush3.bf16.msra.mxu1 %v3076_v19  ;;  %v3088_v32 = vpack.c.bf16 %v287_v27, %v286_v26  ;;  %v3068_v33 = vpack.c.bf16 %v109_v29, %v108_v28  ;;  %v288_v34 = vld [vmem:[#allocation7 + $0x40] sm:$0xff]  ;;  %v289_v35 = vld [vmem:[#allocation7 + $0x48] sm:$0xff]  ;;  %v110_v36 = vld [vmem:[#allocation5 + $0x70] sm:$0xff] }
  0x53   :  { %3053 = vmatprep.subr.bf16.mxu0 %v3052_v8  ;;  %3081 = vmatprep.subr.bf16.mxu1 %v3080_v20  ;;  %v111_v37 = vld [vmem:[#allocation5 + $0x78] sm:$0xff]  ;;  %v3092_v38 = vpack.c.bf16 %v289_v35, %v288_v34  ;;  %v290_v40 = vld [vmem:[#allocation7 + $0x50] sm:$0xff]  ;;  %v292_v43 = vld [vmem:[#allocation7 + $0x60] sm:$0xff] }
  0x54   :  { %v3072_v39 = vpack.c.bf16 %v111_v37, %v110_v36  ;;  %v291_v41 = vld [vmem:[#allocation7 + $0x58] sm:$0xff]  ;;  %v293_v44 = vld [vmem:[#allocation7 + $0x68] sm:$0xff]  ;;  %v82_v47 = vld [vmem:[#allocation2 + $0x10] sm:$0xff] }
  0x55   :  { %v3096_v42 = vpack.c.bf16 %v291_v41, %v290_v40  ;;  %v81_v45 = vld [vmem:[#allocation2 + $0x8] sm:$0xff]  ;;  %v3100_v46 = vpack.c.bf16 %v293_v44, %v292_v43  ;;  %v83_v48 = vld [vmem:[#allocation2 + $0x18] sm:$0xff]  ;;  %v84_v49 = vld [vmem:[#allocation2 + $0x20] sm:$0xff] }
  0x56   :  { %3055 = vmatpush3.bf16.msra.mxu0 %v3052_v8  ;;  %3083 = vmatpush3.bf16.msra.mxu1 %v3080_v20  ;;  %v85_v50 = vld [vmem:[#allocation2 + $0x28] sm:$0xff]  ;;  %v86_v51 = vld [vmem:[#allocation2 + $0x30] sm:$0xff]  ;;  %v87_v52 = vld [vmem:[#allocation2 + $0x38] sm:$0xff] }
  0x57   :  { %3057 = vmatprep.subr.bf16.mxu0 %v3056_v12  ;;  %3085 = vmatprep.subr.bf16.mxu1 %v3084_v30  ;;  %v88_v53 = vld [vmem:[#allocation2 + $0x40] sm:$0xff]  ;;  %v89_v54 = vld [vmem:[#allocation2 + $0x48] sm:$0xff]  ;;  %v90_v55 = vld [vmem:[#allocation2 + $0x50] sm:$0xff] }
  0x58   :  { %v91_v56 = vld [vmem:[#allocation2 + $0x58] sm:$0xff]  ;;  %v92_v57 = vld [vmem:[#allocation2 + $0x60] sm:$0xff]  ;;  %v93_v58 = vld [vmem:[#allocation2 + $0x68] sm:$0xff] }
  0x59   :  { %v94_v59 = vld [vmem:[#allocation2 + $0x70] sm:$0xff]  ;;  %v95_v60 = vld [vmem:[#allocation2 + $0x78] sm:$0xff]  ;;  %v2138_v0 = vld [vmem:[%s4010_s2] ss:$0 sm:$0xff] }
  0x5a   :  { %3059 = vmatpush3.bf16.msra.mxu0 %v3056_v12  ;;  %3087 = vmatpush3.bf16.msra.mxu1 %v3084_v30  ;;  %v294_v61 = vld [vmem:[#allocation7 + $0x70] sm:$0xff]  ;;  %v295_v62 = vld [vmem:[#allocation7 + $0x78] sm:$0xff] }
  0x5b   :  { %3061 = vmatprep.subr.bf16.mxu0 %v3060_v21  ;;  %3089 = vmatprep.subr.bf16.mxu1 %v3088_v32  ;;  %v3104_v63 = vpack.c.bf16 %v295_v62, %v294_v61 }
  0x5e   :  { %3063 = vmatpush3.bf16.msra.mxu0 %v3060_v21  ;;  %3091 = vmatpush3.bf16.msra.mxu1 %v3088_v32 }
  0x5f   :  { %3065 = vmatprep.subr.bf16.mxu0 %v3064_v31  ;;  %3093 = vmatprep.subr.bf16.mxu1 %v3092_v38 }
  0x62   :  { %3067 = vmatpush3.bf16.msra.mxu0 %v3064_v31  ;;  %3095 = vmatpush3.bf16.msra.mxu1 %v3092_v38 }
  0x63   :  { %3069 = vmatprep.subr.bf16.mxu0 %v3068_v33  ;;  %3097 = vmatprep.subr.bf16.mxu1 %v3096_v42 }
  0x66   :  { %3071 = vmatpush3.bf16.msra.mxu0 %v3068_v33  ;;  %3099 = vmatpush3.bf16.msra.mxu1 %v3096_v42 }
  0x67   :  { %3073 = vmatprep.subr.bf16.mxu0 %v3072_v39  ;;  %3101 = vmatprep.subr.bf16.mxu1 %v3100_v46 }
  0x6a   :  { %3075 = vmatpush3.bf16.msra.mxu0 %v3072_v39  ;;  %3103 = vmatpush3.bf16.msra.mxu1 %v3100_v46 }
  0x6b   :  { %3105 = vmatprep.subr.bf16.mxu1 %v3104_v63 }
  0x6d   :  { %2485 = vmatmul.mubr.f32.vlgmr.msra.gmra.mrb[0].mxu0 %v81_v45 }
  0x6e   :  { %2487 = vmatprep.mubr.f32.mxu0 %v82_v47  ;;  %3107 = vmatpush3.bf16.msra.mxu1 %v3104_v63 }
  0x71   :  { %2488 = vmatmul.mubr.f32.gmra.mrb[2].mxu0 %v83_v48 }
  0x72   :  { %2490 = vmatprep.mubr.f32.mxu0 %v84_v49  ;;  %v3433_v49 = vld [vmem:[#allocation8] sm:$0xff]  }
  0x75   :  { %2491 = vmatmul.mubr.f32.gmra.mrb[4].mxu0 %v85_v50  ;;  %v3435_v50 = vld [vmem:[#allocation8 + $0x20] sm:$0xff]  }
  0x76   :  { %2493 = vmatprep.mubr.f32.mxu0 %v86_v51  ;;  %v3442_v51 = vld [vmem:[%s4012_s4] ss:$0 sm:$0xff]  ;;  %s3323_s4 = smov [#allocation10]  }
  0x77   :  { %s2124_s26 = sshll.u32 %s3323_s4, 4  ;;  %s2125_s26 = int_to_ptr.vmem [resolvable:$true] %s2124_s26 }
  0x78   :  { %s3285_s27 = scalar_lea.vmem %s2125_s26, 2048  ;;  %p3290_p5 = scmp.lt.s32.totalorder %s2125_s26, %s2125_s26 }
  0x79   :  { %2494 = vmatmul.mubr.f32.gmra.mrb[6].mxu0 %v87_v52  ;;  %p3286_p4 = scmp.ne.s32.totalorder %s2125_s26, %s3285_s27  ;;  %p3291_p6 = scmp.lt.s32.totalorder %s3285_s27, %s3285_s27 }
  0x7a   :  { %2496 = vmatprep.mubr.f32.mxu0 %v88_v53 }
  0x7b   :  { %p3292_p7 = por %p3291_p6, %p3290_p5 }
  0x7d   :  { %2497 = vmatmul.mubr.f32.gmra.mrb[8].mxu0 %v89_v54  ;;  %p3293_p8 = pnand %p3292_p7, %p3286_p4 }
  0x7e   :  { %2499 = vmatprep.mubr.f32.mxu0 %v90_v55 }
  0x81   :  { %2500 = vmatmul.mubr.f32.gmra.mrb[10].mxu0 %v91_v56 }
  0x82   :  { %2502 = vmatprep.mubr.f32.mxu0 %v92_v57 }
  0x85   :  { %2503 = vmatmul.mubr.f32.gmra.mrb[12].mxu0 %v93_v58 }
  0x86   :  { %2505 = vmatprep.mubr.f32.mxu0 %v94_v59 }
  0x89   :  { %2506 = vmatmul.mubr.f32.gmra.mrb[14].mxu0 %v95_v60 }
  0x8a   :  { %2580 = vmatprep.mubr.bf16.mxu0 %v3433_v49 }
 0x140   :  { %v2486_v1 = vpop.f32.mrb[0].mxu0 }
 0x141   :  { %v191_v2 = vadd.f32 %v2486_v1, %v2138_v0  ;;  %v185_v3 = vpop.f32.mrb[1].mxu0 }
 0x142   :  { %v186_v4 = vadd.f32 %v2138_v0, %v185_v3 }
 0x143   :  { %v265_v7 = vmax.f32 %v191_v2, 0.0 }
 0x144   :  { %v2489_v5 = vpop.f32.mrb[2].mxu0  ;;  %v264_v6 = vmax.f32 %v186_v4, 0.0 }
 0x145   :  { %v201_v8 = vadd.f32 %v2489_v5, %v2138_v0  ;;  %v195_v9 = vpop.f32.mrb[3].mxu0 }
 0x146   :  { %v196_v10 = vadd.f32 %v2138_v0, %v195_v9  ;;  %2540 = vmatprep.mubr.f32.mxu1 %v264_v6 }
 0x147   :  { %2541 = vmatmul.mubr.f32.vlgmr.msra.gmra.mrb[0].mxu1 %v265_v7  ;;  %v267_v13 = vmax.f32 %v201_v8, 0.0 }
 0x148   :  { %v266_v11 = vmax.f32 %v196_v10, 0.0  ;;  %v2492_v12 = vpop.f32.mrb[4].mxu0 }
 0x149   :  { %v211_v14 = vadd.f32 %v2492_v12, %v2138_v0  ;;  %v205_v15 = vpop.f32.mrb[5].mxu0 }
 0x14a   :  { %v206_v16 = vadd.f32 %v2138_v0, %v205_v15  ;;  %2543 = vmatprep.mubr.f32.mxu1 %v266_v11 }
 0x14b   :  { %2544 = vmatmul.mubr.f32.gmra.mrb[2].mxu1 %v267_v13  ;;  %v269_v19 = vmax.f32 %v211_v14, 0.0 }
 0x14c   :  { %v268_v17 = vmax.f32 %v206_v16, 0.0  ;;  %v2495_v18 = vpop.f32.mrb[6].mxu0 }
 0x14d   :  { %v221_v20 = vadd.f32 %v2495_v18, %v2138_v0  ;;  %v215_v21 = vpop.f32.mrb[7].mxu0 }
 0x14e   :  { %v216_v22 = vadd.f32 %v2138_v0, %v215_v21  ;;  %2546 = vmatprep.mubr.f32.mxu1 %v268_v17 }
 0x14f   :  { %2547 = vmatmul.mubr.f32.gmra.mrb[4].mxu1 %v269_v19  ;;  %v271_v25 = vmax.f32 %v221_v20, 0.0 }
 0x150   :  { %v270_v23 = vmax.f32 %v216_v22, 0.0  ;;  %v2498_v24 = vpop.f32.mrb[8].mxu0 }
 0x151   :  { %v231_v26 = vadd.f32 %v2498_v24, %v2138_v0  ;;  %v225_v27 = vpop.f32.mrb[9].mxu0 }
 0x152   :  { %v226_v28 = vadd.f32 %v2138_v0, %v225_v27  ;;  %2549 = vmatprep.mubr.f32.mxu1 %v270_v23 }
 0x153   :  { %2550 = vmatmul.mubr.f32.gmra.mrb[6].mxu1 %v271_v25  ;;  %v273_v31 = vmax.f32 %v231_v26, 0.0 }
 0x154   :  { %v272_v29 = vmax.f32 %v226_v28, 0.0  ;;  %v2501_v30 = vpop.f32.mrb[10].mxu0  ;;  %v3490_v28 = vld [vmem:[#allocation8 + $0x8] sm:$0xff]  }
 0x155   :  { %v241_v32 = vadd.f32 %v2501_v30, %v2138_v0  ;;  %v235_v33 = vpop.f32.mrb[11].mxu0  ;;  %v3494_v30 = vld [vmem:[#allocation8 + $0x10] sm:$0xff]  }
 0x156   :  { %v236_v34 = vadd.f32 %v2138_v0, %v235_v33  ;;  %2552 = vmatprep.mubr.f32.mxu1 %v272_v29  ;;  %v3492_v29 = vld [vmem:[#allocation8 + $0x28] sm:$0xff]   ;;  %v3504_v33 = vld [vmem:[#allocation8 + $0x38] sm:$0xff]  }
 0x157   :  { %2553 = vmatmul.mubr.f32.gmra.mrb[8].mxu1 %v273_v31  ;;  %v275_v37 = vmax.f32 %v241_v32, 0.0  ;;  %v3496_v31 = vld [vmem:[#allocation8 + $0x30] sm:$0xff]   ;;  %v3502_v32 = vld [vmem:[#allocation8 + $0x18] sm:$0xff]  }
 0x158   :  { %v274_v35 = vmax.f32 %v236_v34, 0.0  ;;  %v2504_v36 = vpop.f32.mrb[12].mxu0 }
 0x159   :  { %v251_v38 = vadd.f32 %v2504_v36, %v2138_v0  ;;  %v245_v39 = vpop.f32.mrb[13].mxu0 }
 0x15a   :  { %v246_v40 = vadd.f32 %v2138_v0, %v245_v39  ;;  %2555 = vmatprep.mubr.f32.mxu1 %v274_v35 }
 0x15b   :  { %2556 = vmatmul.mubr.f32.gmra.mrb[10].mxu1 %v275_v37  ;;  %v277_v43 = vmax.f32 %v251_v38, 0.0 }
 0x15c   :  { %v276_v41 = vmax.f32 %v246_v40, 0.0  ;;  %v2507_v42 = vpop.f32.mrb[14].mxu0 }
 0x15d   :  { %v261_v44 = vadd.f32 %v2507_v42, %v2138_v0  ;;  %v255_v45 = vpop.f32.mrb[15].mxu0 }
 0x15e   :  { %v256_v46 = vadd.f32 %v2138_v0, %v255_v45  ;;  %2558 = vmatprep.mubr.f32.mxu1 %v276_v41 }
 0x15f   :  { %2559 = vmatmul.mubr.f32.gmra.mrb[12].mxu1 %v277_v43  ;;  %v279_v48 = vmax.f32 %v261_v44, 0.0 }
 0x160   :  { %v278_v47 = vmax.f32 %v256_v46, 0.0 }
 0x162   :  { %2561 = vmatprep.mubr.f32.mxu1 %v278_v47 }
 0x163   :  { %2562 = vmatmul.mubr.f32.gmra.mrb[14].mxu1 %v279_v48 }
 0x164   :  { %2604 = vmatprep.mubr.bf16.mxu1 %v3435_v50 }
 0x21a   :  { %v2542_v52 = vpop.f32.mrb[0].mxu1 }
 0x21b   :  { %v3445_v53 = vadd.f32 %v2542_v52, %v3442_v51  ;;  %v369_v54 = vpop.f32.mrb[1].mxu1 }
 0x21c   :  { %v3448_v55 = vadd.f32 %v3442_v51, %v369_v54 }
 0x21d   :  { %v3511_v34 = vmul.f32 0.1, %v3445_v53 }
 0x21e   :  { %v480_v56 = vpack.c.bf16 %v3445_v53, %v3448_v55  ;;  %v2545_v57 = vpop.f32.mrb[2].mxu1  ;;  %v3514_v35 = vmul.f32 0.1, %v3448_v55 }
 0x21f   :  { %v3453_v58 = vadd.f32 %v2545_v57, %v3442_v51  ;;  %v379_v59 = vpop.f32.mrb[3].mxu1 }
 0x220   :  { %v3456_v60 = vadd.f32 %v3442_v51, %v379_v59  ;;  %2564 = vmatprep.subr.bf16.mxu0 %v480_v56  ;;  %2588 = vmatprep.subr.bf16.mxu1 %v480_v56 }
 0x221   :  { %2565 = vmatpush3.bf16.msra.mxu0 %v480_v56  ;;  %2589 = vmatpush3.bf16.msra.mxu1 %v480_v56  ;;  %v3517_v36 = vmul.f32 0.1, %v3453_v58 }
 0x222   :  { %v481_v61 = vpack.c.bf16 %v3453_v58, %v3456_v60  ;;  %v2548_v62 = vpop.f32.mrb[4].mxu1  ;;  %v3520_v37 = vmul.f32 0.1, %v3456_v60 }
 0x223   :  { %v3461_v63 = vadd.f32 %v2548_v62, %v3442_v51  ;;  %v389_v0 = vpop.f32.mrb[5].mxu1 }
 0x224   :  { %v3464_v1 = vadd.f32 %v3442_v51, %v389_v0  ;;  %2566 = vmatprep.subr.bf16.mxu0 %v481_v61  ;;  %2590 = vmatprep.subr.bf16.mxu1 %v481_v61 }
 0x225   :  { %2567 = vmatpush3.bf16.msra.mxu0 %v481_v61  ;;  %2591 = vmatpush3.bf16.msra.mxu1 %v481_v61 }
 0x226   :  { %v482_v2 = vpack.c.bf16 %v3461_v63, %v3464_v1  ;;  %v2551_v3 = vpop.f32.mrb[6].mxu1 }
 0x227   :  { %v3469_v4 = vadd.f32 %v2551_v3, %v3442_v51  ;;  %v399_v5 = vpop.f32.mrb[7].mxu1  ;;  %v3542_v3 = vmul.f32 0.1, %v3464_v1 }
 0x228   :  { %v3472_v6 = vadd.f32 %v3442_v51, %v399_v5  ;;  %2568 = vmatprep.subr.bf16.mxu0 %v482_v2  ;;  %2592 = vmatprep.subr.bf16.mxu1 %v482_v2 }
 0x229   :  { %2569 = vmatpush3.bf16.msra.mxu0 %v482_v2  ;;  %2593 = vmatpush3.bf16.msra.mxu1 %v482_v2  ;;  %v3539_v2 = vmul.f32 0.1, %v3461_v63  ;;  %v3545_v5 = vmul.f32 0.1, %v3469_v4 }
 0x22a   :  { %v483_v7 = vpack.c.bf16 %v3469_v4, %v3472_v6  ;;  %v2554_v8 = vpop.f32.mrb[8].mxu1 }
 0x22b   :  { %v415_v9 = vadd.f32 %v2554_v8, %v3442_v51  ;;  %v409_v10 = vpop.f32.mrb[9].mxu1 }
 0x22c   :  { %v410_v11 = vadd.f32 %v3442_v51, %v409_v10  ;;  %2570 = vmatprep.subr.bf16.mxu0 %v483_v7  ;;  %2594 = vmatprep.subr.bf16.mxu1 %v483_v7 }
 0x22d   :  { %2571 = vmatpush3.bf16.msra.mxu0 %v483_v7  ;;  %2595 = vmatpush3.bf16.msra.mxu1 %v483_v7  ;;  %v3526_v44 = vmul.f32 0.1, %v415_v9  ;;  %v3548_v7 = vmul.f32 0.1, %v3472_v6 }
 0x22e   :  { %v484_v12 = vpack.c.bf16 %v415_v9, %v410_v11  ;;  %v2557_v13 = vpop.f32.mrb[10].mxu1  ;;  %v3528_v45 = vmul.f32 0.1, %v410_v11 }
 0x22f   :  { %v425_v14 = vadd.f32 %v2557_v13, %v3442_v51  ;;  %v419_v15 = vpop.f32.mrb[11].mxu1 }
 0x230   :  { %v420_v16 = vadd.f32 %v3442_v51, %v419_v15  ;;  %2572 = vmatprep.subr.bf16.mxu0 %v484_v12  ;;  %2596 = vmatprep.subr.bf16.mxu1 %v484_v12 }
 0x231   :  { %2573 = vmatpush3.bf16.msra.mxu0 %v484_v12  ;;  %2597 = vmatpush3.bf16.msra.mxu1 %v484_v12  ;;  %v3522_v40 = vmul.f32 0.1, %v425_v14 }
 0x232   :  { %v485_v17 = vpack.c.bf16 %v425_v14, %v420_v16  ;;  %v2560_v18 = vpop.f32.mrb[12].mxu1  ;;  %v3524_v41 = vmul.f32 0.1, %v420_v16 }
 0x233   :  { %v3481_v19 = vadd.f32 %v2560_v18, %v3442_v51  ;;  %v429_v20 = vpop.f32.mrb[13].mxu1 }
 0x234   :  { %v3484_v21 = vadd.f32 %v3442_v51, %v429_v20  ;;  %2574 = vmatprep.subr.bf16.mxu0 %v485_v17  ;;  %2598 = vmatprep.subr.bf16.mxu1 %v485_v17 }
 0x235   :  { %2575 = vmatpush3.bf16.msra.mxu0 %v485_v17  ;;  %2599 = vmatpush3.bf16.msra.mxu1 %v485_v17  ;;  %v3555_v1 = vmul.f32 0.1, %v3481_v19 }
 0x236   :  { %v486_v22 = vpack.c.bf16 %v3481_v19, %v3484_v21  ;;  %v2563_v23 = vpop.f32.mrb[14].mxu1  ;;  %v3558_v4 = vmul.f32 0.1, %v3484_v21 }
 0x237   :  { %v445_v24 = vadd.f32 %v2563_v23, %v3442_v51  ;;  %v439_v25 = vpop.f32.mrb[15].mxu1 }
 0x238   :  { %v440_v26 = vadd.f32 %v3442_v51, %v439_v25  ;;  %2576 = vmatprep.subr.bf16.mxu0 %v486_v22  ;;  %2600 = vmatprep.subr.bf16.mxu1 %v486_v22 }
 0x239   :  { %2577 = vmatpush3.bf16.msra.mxu0 %v486_v22  ;;  %2601 = vmatpush3.bf16.msra.mxu1 %v486_v22  ;;  %v3550_v10 = vmul.f32 0.1, %v445_v24 }
 0x23a   :  { %v487_v27 = vpack.c.bf16 %v445_v24, %v440_v26  ;;  %v3552_v11 = vmul.f32 0.1, %v440_v26 }
 0x23c   :  { %2578 = vmatprep.subr.bf16.mxu0 %v487_v27  ;;  %2602 = vmatprep.subr.bf16.mxu1 %v487_v27 }
 0x23d   :  { %2579 = vmatpush3.bf16.msra.mxu0 %v487_v27  ;;  %2603 = vmatpush3.bf16.msra.mxu1 %v487_v27 }
 0x240   :  { %2581 = vmatmul.mubr.bf16.vlgmr.msra.gmra.mrb[16].mxu0 %v3490_v28  ;;  %2605 = vmatmul.mubr.bf16.vlgmr.msra.gmra.mrb[16].mxu1 %v3492_v29 }
 0x241   :  { %2584 = vmatprep.mubr.bf16.mxu0 %v3494_v30  ;;  %2608 = vmatprep.mubr.bf16.mxu1 %v3496_v31 }
 0x248   :  { %2585 = vmatmul.mubr.bf16.gmra.mrb[20].mxu0 %v3502_v32  ;;  %2609 = vmatmul.mubr.bf16.gmra.mrb[20].mxu1 %v3504_v33 }
 0x249   :  { %2628 = vmatprep.mubr.bf16.mxu0 %v3433_v49  ;;  %2652 = vmatprep.mubr.bf16.mxu1 %v3435_v50 }
 0x313   :  { %v2582_v38 = vpop.f32.mrb[16].mxu0  ;;  %v2606_v39 = vpop.f32.mrb[16].mxu1 }
 0x314   :  { %v546_v42 = vpop.f32.mrb[17].mxu0  ;;  %v635_v43 = vpop.f32.mrb[17].mxu1  ;;  %v555_v48 = vadd.f32 %v2582_v38, %v3520_v37  ;;  %v644_v51 = vadd.f32 %v2606_v39, %v3524_v41 }
 0x315   :  { %v2583_v46 = vpop.f32.mrb[18].mxu0  ;;  %v2607_v47 = vpop.f32.mrb[18].mxu1  ;;  %v547_v56 = vadd.f32 %v546_v42, %v3514_v35  ;;  %v636_v57 = vadd.f32 %v635_v43, %v3528_v45 }
 0x316   :  { %v558_v52 = vadd.f32 %v2583_v46, %v3517_v36  ;;  %v647_v53 = vadd.f32 %v2607_v47, %v3522_v40  ;;  %v549_v54 = vpop.f32.mrb[19].mxu0  ;;  %v638_v55 = vpop.f32.mrb[19].mxu1 }
 0x317   :  { %v550_v58 = vadd.f32 %v549_v54, %v3511_v34  ;;  %v639_v59 = vadd.f32 %v638_v55, %v3526_v44 }
 0x318   :  { %v667_v60 = vpack.c.bf16 %v558_v52, %v555_v48  ;;  %v671_v61 = vpack.c.bf16 %v647_v53, %v644_v51 }
 0x319   :  { %v666_v62 = vpack.c.bf16 %v550_v58, %v547_v56  ;;  %v670_v0 = vpack.c.bf16 %v639_v59, %v636_v57 }
 0x31b   :  { %v2586_v8 = vpop.f32.mrb[20].mxu0  ;;  %v2610_v9 = vpop.f32.mrb[20].mxu1  ;;  %2612 = vmatprep.subr.bf16.mxu0 %v666_v62  ;;  %2636 = vmatprep.subr.bf16.mxu1 %v666_v62 }
 0x31c   :  { %v562_v12 = vpop.f32.mrb[21].mxu0  ;;  %v651_v63 = vpop.f32.mrb[21].mxu1  ;;  %2613 = vmatpush3.bf16.msra.mxu0 %v666_v62  ;;  %2637 = vmatpush3.bf16.msra.mxu1 %v666_v62  ;;  %v571_v14 = vadd.f32 %v2586_v8, %v3548_v7  ;;  %v660_v15 = vadd.f32 %v2610_v9, %v3552_v11 }
 0x31d   :  { %v2587_v6 = vpop.f32.mrb[22].mxu0  ;;  %v2611_v13 = vpop.f32.mrb[22].mxu1  ;;  %2614 = vmatprep.subr.bf16.mxu0 %v667_v60  ;;  %2638 = vmatprep.subr.bf16.mxu1 %v667_v60  ;;  %v563_v19 = vadd.f32 %v562_v12, %v3542_v3  ;;  %v652_v22 = vadd.f32 %v651_v63, %v3558_v4 }
 0x31e   :  { %v574_v16 = vadd.f32 %v2587_v6, %v3545_v5  ;;  %v663_v17 = vadd.f32 %v2611_v13, %v3550_v10  ;;  %v565_v18 = vpop.f32.mrb[23].mxu0  ;;  %v654_v20 = vpop.f32.mrb[23].mxu1 }
 0x31f   :  { %v566_v21 = vadd.f32 %v565_v18, %v3539_v2  ;;  %v655_v23 = vadd.f32 %v654_v20, %v3555_v1 }
 0x320   :  { %v669_v24 = vpack.c.bf16 %v574_v16, %v571_v14  ;;  %v673_v25 = vpack.c.bf16 %v663_v17, %v660_v15  ;;  %2615 = vmatpush3.bf16.msra.mxu0 %v667_v60  ;;  %2639 = vmatpush3.bf16.msra.mxu1 %v667_v60 }
 0x321   :  { %v668_v26 = vpack.c.bf16 %v566_v21, %v563_v19  ;;  %v672_v27 = vpack.c.bf16 %v655_v23, %v652_v22 }
 0x323   :  { %2616 = vmatprep.subr.bf16.mxu0 %v668_v26  ;;  %2640 = vmatprep.subr.bf16.mxu1 %v668_v26 }
 0x324   :  { %2617 = vmatpush3.bf16.msra.mxu0 %v668_v26  ;;  %2641 = vmatpush3.bf16.msra.mxu1 %v668_v26 }
 0x325   :  { %2618 = vmatprep.subr.bf16.mxu0 %v669_v24  ;;  %2642 = vmatprep.subr.bf16.mxu1 %v669_v24 }
 0x328   :  { %2619 = vmatpush3.bf16.msra.mxu0 %v669_v24  ;;  %2643 = vmatpush3.bf16.msra.mxu1 %v669_v24 }
 0x329   :  { %2620 = vmatprep.subr.bf16.mxu0 %v670_v0  ;;  %2644 = vmatprep.subr.bf16.mxu1 %v670_v0 }
 0x32c   :  { %2621 = vmatpush3.bf16.msra.mxu0 %v670_v0  ;;  %2645 = vmatpush3.bf16.msra.mxu1 %v670_v0 }
 0x32d   :  { %2622 = vmatprep.subr.bf16.mxu0 %v671_v61  ;;  %2646 = vmatprep.subr.bf16.mxu1 %v671_v61 }
 0x330   :  { %2623 = vmatpush3.bf16.msra.mxu0 %v671_v61  ;;  %2647 = vmatpush3.bf16.msra.mxu1 %v671_v61 }
 0x331   :  { %2624 = vmatprep.subr.bf16.mxu0 %v672_v27  ;;  %2648 = vmatprep.subr.bf16.mxu1 %v672_v27 }
 0x334   :  { %2625 = vmatpush3.bf16.msra.mxu0 %v672_v27  ;;  %2649 = vmatpush3.bf16.msra.mxu1 %v672_v27 }
 0x335   :  { %2626 = vmatprep.subr.bf16.mxu0 %v673_v25  ;;  %2650 = vmatprep.subr.bf16.mxu1 %v673_v25 }
 0x338   :  { %2627 = vmatpush3.bf16.msra.mxu0 %v673_v25  ;;  %2651 = vmatpush3.bf16.msra.mxu1 %v673_v25 }
 0x33b   :  { %2629 = vmatmul.mubr.bf16.vlgmr.msra.gmra.mrb[24].mxu0 %v3490_v28  ;;  %2653 = vmatmul.mubr.bf16.vlgmr.msra.gmra.mrb[24].mxu1 %v3492_v29 }
 0x33c   :  { %2632 = vmatprep.mubr.bf16.mxu0 %v3494_v30  ;;  %2656 = vmatprep.mubr.bf16.mxu1 %v3496_v31 }
 0x343   :  { %2633 = vmatmul.mubr.bf16.gmra.mrb[28].mxu0 %v3502_v32  ;;  %2657 = vmatmul.mubr.bf16.gmra.mrb[28].mxu1 %v3504_v33 }
 0x344   :  { %2676 = vmatprep.mubr.bf16.mxu0 %v3433_v49  ;;  %2700 = vmatprep.mubr.bf16.mxu1 %v3435_v50 }
 0x40e   :  { %v2630_v38 = vpop.f32.mrb[24].mxu0  ;;  %v2654_v39 = vpop.f32.mrb[24].mxu1 }
 0x40f   :  { %v708_v42 = vpop.f32.mrb[25].mxu0  ;;  %v773_v43 = vpop.f32.mrb[25].mxu1  ;;  %v717_v48 = vadd.f32 %v2630_v38, %v3520_v37  ;;  %v782_v51 = vadd.f32 %v2654_v39, %v3524_v41 }
 0x410   :  { %v2631_v46 = vpop.f32.mrb[26].mxu0  ;;  %v2655_v47 = vpop.f32.mrb[26].mxu1  ;;  %v709_v56 = vadd.f32 %v708_v42, %v3514_v35  ;;  %v774_v57 = vadd.f32 %v773_v43, %v3528_v45 }
 0x411   :  { %v720_v52 = vadd.f32 %v2631_v46, %v3517_v36  ;;  %v785_v53 = vadd.f32 %v2655_v47, %v3522_v40  ;;  %v711_v54 = vpop.f32.mrb[27].mxu0  ;;  %v776_v55 = vpop.f32.mrb[27].mxu1 }
 0x412   :  { %v712_v58 = vadd.f32 %v711_v54, %v3511_v34  ;;  %v777_v59 = vadd.f32 %v776_v55, %v3526_v44 }
 0x413   :  { %v805_v60 = vpack.c.bf16 %v720_v52, %v717_v48  ;;  %v809_v61 = vpack.c.bf16 %v785_v53, %v782_v51 }
 0x414   :  { %v804_v62 = vpack.c.bf16 %v712_v58, %v709_v56  ;;  %v808_v0 = vpack.c.bf16 %v777_v59, %v774_v57 }
 0x416   :  { %v2634_v8 = vpop.f32.mrb[28].mxu0  ;;  %v2658_v9 = vpop.f32.mrb[28].mxu1  ;;  %2660 = vmatprep.subr.bf16.mxu0 %v804_v62  ;;  %2684 = vmatprep.subr.bf16.mxu1 %v804_v62 }
 0x417   :  { %v724_v12 = vpop.f32.mrb[29].mxu0  ;;  %v789_v63 = vpop.f32.mrb[29].mxu1  ;;  %2661 = vmatpush3.bf16.msra.mxu0 %v804_v62  ;;  %2685 = vmatpush3.bf16.msra.mxu1 %v804_v62  ;;  %v733_v14 = vadd.f32 %v2634_v8, %v3548_v7  ;;  %v798_v15 = vadd.f32 %v2658_v9, %v3552_v11 }
 0x418   :  { %v2635_v6 = vpop.f32.mrb[30].mxu0  ;;  %v2659_v13 = vpop.f32.mrb[30].mxu1  ;;  %2662 = vmatprep.subr.bf16.mxu0 %v805_v60  ;;  %2686 = vmatprep.subr.bf16.mxu1 %v805_v60  ;;  %v725_v19 = vadd.f32 %v724_v12, %v3542_v3  ;;  %v790_v22 = vadd.f32 %v789_v63, %v3558_v4 }
 0x419   :  { %v736_v16 = vadd.f32 %v2635_v6, %v3545_v5  ;;  %v801_v17 = vadd.f32 %v2659_v13, %v3550_v10  ;;  %v727_v18 = vpop.f32.mrb[31].mxu0  ;;  %v792_v20 = vpop.f32.mrb[31].mxu1 }
 0x41a   :  { %v728_v21 = vadd.f32 %v727_v18, %v3539_v2  ;;  %v793_v23 = vadd.f32 %v792_v20, %v3555_v1 }
 0x41b   :  { %v807_v24 = vpack.c.bf16 %v736_v16, %v733_v14  ;;  %v811_v25 = vpack.c.bf16 %v801_v17, %v798_v15  ;;  %2663 = vmatpush3.bf16.msra.mxu0 %v805_v60  ;;  %2687 = vmatpush3.bf16.msra.mxu1 %v805_v60 }
 0x41c   :  { %v806_v26 = vpack.c.bf16 %v728_v21, %v725_v19  ;;  %v810_v27 = vpack.c.bf16 %v793_v23, %v790_v22 }
 0x41e   :  { %2664 = vmatprep.subr.bf16.mxu0 %v806_v26  ;;  %2688 = vmatprep.subr.bf16.mxu1 %v806_v26 }
 0x41f   :  { %2665 = vmatpush3.bf16.msra.mxu0 %v806_v26  ;;  %2689 = vmatpush3.bf16.msra.mxu1 %v806_v26 }
 0x420   :  { %2666 = vmatprep.subr.bf16.mxu0 %v807_v24  ;;  %2690 = vmatprep.subr.bf16.mxu1 %v807_v24 }
 0x423   :  { %2667 = vmatpush3.bf16.msra.mxu0 %v807_v24  ;;  %2691 = vmatpush3.bf16.msra.mxu1 %v807_v24 }
 0x424   :  { %2668 = vmatprep.subr.bf16.mxu0 %v808_v0  ;;  %2692 = vmatprep.subr.bf16.mxu1 %v808_v0 }
 0x427   :  { %2669 = vmatpush3.bf16.msra.mxu0 %v808_v0  ;;  %2693 = vmatpush3.bf16.msra.mxu1 %v808_v0 }
 0x428   :  { %2670 = vmatprep.subr.bf16.mxu0 %v809_v61  ;;  %2694 = vmatprep.subr.bf16.mxu1 %v809_v61 }
 0x42b   :  { %2671 = vmatpush3.bf16.msra.mxu0 %v809_v61  ;;  %2695 = vmatpush3.bf16.msra.mxu1 %v809_v61 }
 0x42c   :  { %2672 = vmatprep.subr.bf16.mxu0 %v810_v27  ;;  %2696 = vmatprep.subr.bf16.mxu1 %v810_v27 }
 0x42f   :  { %2673 = vmatpush3.bf16.msra.mxu0 %v810_v27  ;;  %2697 = vmatpush3.bf16.msra.mxu1 %v810_v27 }
 0x430   :  { %2674 = vmatprep.subr.bf16.mxu0 %v811_v25  ;;  %2698 = vmatprep.subr.bf16.mxu1 %v811_v25 }
 0x433   :  { %2675 = vmatpush3.bf16.msra.mxu0 %v811_v25  ;;  %2699 = vmatpush3.bf16.msra.mxu1 %v811_v25 }
 0x436   :  { %2677 = vmatmul.mubr.bf16.vlgmr.msra.gmra.mrb[32].mxu0 %v3490_v28  ;;  %2701 = vmatmul.mubr.bf16.vlgmr.msra.gmra.mrb[32].mxu1 %v3492_v29 }
 0x437   :  { %2680 = vmatprep.mubr.bf16.mxu0 %v3494_v30  ;;  %2704 = vmatprep.mubr.bf16.mxu1 %v3496_v31 }
 0x43e   :  { %2681 = vmatmul.mubr.bf16.gmra.mrb[36].mxu0 %v3502_v32  ;;  %2705 = vmatmul.mubr.bf16.gmra.mrb[36].mxu1 %v3504_v33 }
 0x43f   :  { %2724 = vmatprep.mubr.bf16.mxu0 %v3433_v49  ;;  %2748 = vmatprep.mubr.bf16.mxu1 %v3435_v50 }
 0x509   :  { %v2678_v38 = vpop.f32.mrb[32].mxu0  ;;  %v2702_v39 = vpop.f32.mrb[32].mxu1 }
 0x50a   :  { %v846_v42 = vpop.f32.mrb[33].mxu0  ;;  %v911_v43 = vpop.f32.mrb[33].mxu1  ;;  %v855_v48 = vadd.f32 %v2678_v38, %v3520_v37  ;;  %v920_v51 = vadd.f32 %v2702_v39, %v3524_v41 }
 0x50b   :  { %v2679_v46 = vpop.f32.mrb[34].mxu0  ;;  %v2703_v47 = vpop.f32.mrb[34].mxu1  ;;  %v847_v56 = vadd.f32 %v846_v42, %v3514_v35  ;;  %v912_v57 = vadd.f32 %v911_v43, %v3528_v45 }
 0x50c   :  { %v858_v52 = vadd.f32 %v2679_v46, %v3517_v36  ;;  %v923_v53 = vadd.f32 %v2703_v47, %v3522_v40  ;;  %v849_v54 = vpop.f32.mrb[35].mxu0  ;;  %v914_v55 = vpop.f32.mrb[35].mxu1 }
 0x50d   :  { %v850_v58 = vadd.f32 %v849_v54, %v3511_v34  ;;  %v915_v59 = vadd.f32 %v914_v55, %v3526_v44 }
 0x50e   :  { %v943_v60 = vpack.c.bf16 %v858_v52, %v855_v48  ;;  %v947_v61 = vpack.c.bf16 %v923_v53, %v920_v51 }
 0x50f   :  { %v942_v62 = vpack.c.bf16 %v850_v58, %v847_v56  ;;  %v946_v0 = vpack.c.bf16 %v915_v59, %v912_v57 }
 0x511   :  { %v2682_v8 = vpop.f32.mrb[36].mxu0  ;;  %v2706_v9 = vpop.f32.mrb[36].mxu1  ;;  %2708 = vmatprep.subr.bf16.mxu0 %v942_v62  ;;  %2732 = vmatprep.subr.bf16.mxu1 %v942_v62 }
 0x512   :  { %v862_v12 = vpop.f32.mrb[37].mxu0  ;;  %v927_v63 = vpop.f32.mrb[37].mxu1  ;;  %2709 = vmatpush3.bf16.msra.mxu0 %v942_v62  ;;  %2733 = vmatpush3.bf16.msra.mxu1 %v942_v62  ;;  %v871_v14 = vadd.f32 %v2682_v8, %v3548_v7  ;;  %v936_v15 = vadd.f32 %v2706_v9, %v3552_v11 }
 0x513   :  { %v2683_v6 = vpop.f32.mrb[38].mxu0  ;;  %v2707_v13 = vpop.f32.mrb[38].mxu1  ;;  %2710 = vmatprep.subr.bf16.mxu0 %v943_v60  ;;  %2734 = vmatprep.subr.bf16.mxu1 %v943_v60  ;;  %v863_v19 = vadd.f32 %v862_v12, %v3542_v3  ;;  %v928_v22 = vadd.f32 %v927_v63, %v3558_v4 }
 0x514   :  { %v874_v16 = vadd.f32 %v2683_v6, %v3545_v5  ;;  %v939_v17 = vadd.f32 %v2707_v13, %v3550_v10  ;;  %v865_v18 = vpop.f32.mrb[39].mxu0  ;;  %v930_v20 = vpop.f32.mrb[39].mxu1 }
 0x515   :  { %v866_v21 = vadd.f32 %v865_v18, %v3539_v2  ;;  %v931_v23 = vadd.f32 %v930_v20, %v3555_v1 }
 0x516   :  { %v945_v24 = vpack.c.bf16 %v874_v16, %v871_v14  ;;  %v949_v25 = vpack.c.bf16 %v939_v17, %v936_v15  ;;  %2711 = vmatpush3.bf16.msra.mxu0 %v943_v60  ;;  %2735 = vmatpush3.bf16.msra.mxu1 %v943_v60 }
 0x517   :  { %v944_v26 = vpack.c.bf16 %v866_v21, %v863_v19  ;;  %v948_v27 = vpack.c.bf16 %v931_v23, %v928_v22 }
 0x519   :  { %2712 = vmatprep.subr.bf16.mxu0 %v944_v26  ;;  %2736 = vmatprep.subr.bf16.mxu1 %v944_v26 }
 0x51a   :  { %2713 = vmatpush3.bf16.msra.mxu0 %v944_v26  ;;  %2737 = vmatpush3.bf16.msra.mxu1 %v944_v26 }
 0x51b   :  { %2714 = vmatprep.subr.bf16.mxu0 %v945_v24  ;;  %2738 = vmatprep.subr.bf16.mxu1 %v945_v24 }
 0x51e   :  { %2715 = vmatpush3.bf16.msra.mxu0 %v945_v24  ;;  %2739 = vmatpush3.bf16.msra.mxu1 %v945_v24 }
 0x51f   :  { %2716 = vmatprep.subr.bf16.mxu0 %v946_v0  ;;  %2740 = vmatprep.subr.bf16.mxu1 %v946_v0 }
 0x522   :  { %2717 = vmatpush3.bf16.msra.mxu0 %v946_v0  ;;  %2741 = vmatpush3.bf16.msra.mxu1 %v946_v0 }
 0x523   :  { %2718 = vmatprep.subr.bf16.mxu0 %v947_v61  ;;  %2742 = vmatprep.subr.bf16.mxu1 %v947_v61 }
 0x526   :  { %2719 = vmatpush3.bf16.msra.mxu0 %v947_v61  ;;  %2743 = vmatpush3.bf16.msra.mxu1 %v947_v61 }
 0x527   :  { %2720 = vmatprep.subr.bf16.mxu0 %v948_v27  ;;  %2744 = vmatprep.subr.bf16.mxu1 %v948_v27 }
 0x52a   :  { %2721 = vmatpush3.bf16.msra.mxu0 %v948_v27  ;;  %2745 = vmatpush3.bf16.msra.mxu1 %v948_v27 }
 0x52b   :  { %2722 = vmatprep.subr.bf16.mxu0 %v949_v25  ;;  %2746 = vmatprep.subr.bf16.mxu1 %v949_v25 }
 0x52e   :  { %2723 = vmatpush3.bf16.msra.mxu0 %v949_v25  ;;  %2747 = vmatpush3.bf16.msra.mxu1 %v949_v25 }
 0x531   :  { %2725 = vmatmul.mubr.bf16.vlgmr.msra.gmra.mrb[40].mxu0 %v3490_v28  ;;  %2749 = vmatmul.mubr.bf16.vlgmr.msra.gmra.mrb[40].mxu1 %v3492_v29 }
 0x532   :  { %2728 = vmatprep.mubr.bf16.mxu0 %v3494_v30  ;;  %2752 = vmatprep.mubr.bf16.mxu1 %v3496_v31 }
 0x539   :  { %2729 = vmatmul.mubr.bf16.gmra.mrb[44].mxu0 %v3502_v32  ;;  %2753 = vmatmul.mubr.bf16.gmra.mrb[44].mxu1 %v3504_v33 }
 0x53a   :  { %2772 = vmatprep.mubr.bf16.mxu0 %v3433_v49  ;;  %2796 = vmatprep.mubr.bf16.mxu1 %v3435_v50 }
 0x604   :  { %v2726_v38 = vpop.f32.mrb[40].mxu0  ;;  %v2750_v39 = vpop.f32.mrb[40].mxu1 }
 0x605   :  { %v984_v42 = vpop.f32.mrb[41].mxu0  ;;  %v1049_v43 = vpop.f32.mrb[41].mxu1  ;;  %v993_v48 = vadd.f32 %v2726_v38, %v3520_v37  ;;  %v1058_v51 = vadd.f32 %v2750_v39, %v3524_v41 }
 0x606   :  { %v2727_v46 = vpop.f32.mrb[42].mxu0  ;;  %v2751_v47 = vpop.f32.mrb[42].mxu1  ;;  %v985_v56 = vadd.f32 %v984_v42, %v3514_v35  ;;  %v1050_v57 = vadd.f32 %v1049_v43, %v3528_v45 }
 0x607   :  { %v996_v52 = vadd.f32 %v2727_v46, %v3517_v36  ;;  %v1061_v53 = vadd.f32 %v2751_v47, %v3522_v40  ;;  %v987_v54 = vpop.f32.mrb[43].mxu0  ;;  %v1052_v55 = vpop.f32.mrb[43].mxu1 }
 0x608   :  { %v988_v58 = vadd.f32 %v987_v54, %v3511_v34  ;;  %v1053_v59 = vadd.f32 %v1052_v55, %v3526_v44 }
 0x609   :  { %v1081_v60 = vpack.c.bf16 %v996_v52, %v993_v48  ;;  %v1085_v61 = vpack.c.bf16 %v1061_v53, %v1058_v51 }
 0x60a   :  { %v1080_v62 = vpack.c.bf16 %v988_v58, %v985_v56  ;;  %v1084_v0 = vpack.c.bf16 %v1053_v59, %v1050_v57 }
 0x60c   :  { %v2730_v8 = vpop.f32.mrb[44].mxu0  ;;  %v2754_v9 = vpop.f32.mrb[44].mxu1  ;;  %2756 = vmatprep.subr.bf16.mxu0 %v1080_v62  ;;  %2780 = vmatprep.subr.bf16.mxu1 %v1080_v62 }
 0x60d   :  { %v1000_v12 = vpop.f32.mrb[45].mxu0  ;;  %v1065_v63 = vpop.f32.mrb[45].mxu1  ;;  %2757 = vmatpush3.bf16.msra.mxu0 %v1080_v62  ;;  %2781 = vmatpush3.bf16.msra.mxu1 %v1080_v62  ;;  %v1009_v14 = vadd.f32 %v2730_v8, %v3548_v7  ;;  %v1074_v15 = vadd.f32 %v2754_v9, %v3552_v11 }
 0x60e   :  { %v2731_v6 = vpop.f32.mrb[46].mxu0  ;;  %v2755_v13 = vpop.f32.mrb[46].mxu1  ;;  %2758 = vmatprep.subr.bf16.mxu0 %v1081_v60  ;;  %2782 = vmatprep.subr.bf16.mxu1 %v1081_v60  ;;  %v1001_v19 = vadd.f32 %v1000_v12, %v3542_v3  ;;  %v1066_v22 = vadd.f32 %v1065_v63, %v3558_v4 }
 0x60f   :  { %v1012_v16 = vadd.f32 %v2731_v6, %v3545_v5  ;;  %v1077_v17 = vadd.f32 %v2755_v13, %v3550_v10  ;;  %v1003_v18 = vpop.f32.mrb[47].mxu0  ;;  %v1068_v20 = vpop.f32.mrb[47].mxu1 }
 0x610   :  { %v1004_v21 = vadd.f32 %v1003_v18, %v3539_v2  ;;  %v1069_v23 = vadd.f32 %v1068_v20, %v3555_v1 }
 0x611   :  { %v1083_v24 = vpack.c.bf16 %v1012_v16, %v1009_v14  ;;  %v1087_v25 = vpack.c.bf16 %v1077_v17, %v1074_v15  ;;  %2759 = vmatpush3.bf16.msra.mxu0 %v1081_v60  ;;  %2783 = vmatpush3.bf16.msra.mxu1 %v1081_v60 }
 0x612   :  { %v1082_v26 = vpack.c.bf16 %v1004_v21, %v1001_v19  ;;  %v1086_v27 = vpack.c.bf16 %v1069_v23, %v1066_v22 }
 0x614   :  { %2760 = vmatprep.subr.bf16.mxu0 %v1082_v26  ;;  %2784 = vmatprep.subr.bf16.mxu1 %v1082_v26 }
 0x615   :  { %2761 = vmatpush3.bf16.msra.mxu0 %v1082_v26  ;;  %2785 = vmatpush3.bf16.msra.mxu1 %v1082_v26 }
 0x616   :  { %2762 = vmatprep.subr.bf16.mxu0 %v1083_v24  ;;  %2786 = vmatprep.subr.bf16.mxu1 %v1083_v24 }
 0x619   :  { %2763 = vmatpush3.bf16.msra.mxu0 %v1083_v24  ;;  %2787 = vmatpush3.bf16.msra.mxu1 %v1083_v24 }
 0x61a   :  { %2764 = vmatprep.subr.bf16.mxu0 %v1084_v0  ;;  %2788 = vmatprep.subr.bf16.mxu1 %v1084_v0 }
 0x61d   :  { %2765 = vmatpush3.bf16.msra.mxu0 %v1084_v0  ;;  %2789 = vmatpush3.bf16.msra.mxu1 %v1084_v0 }
 0x61e   :  { %2766 = vmatprep.subr.bf16.mxu0 %v1085_v61  ;;  %2790 = vmatprep.subr.bf16.mxu1 %v1085_v61 }
 0x621   :  { %2767 = vmatpush3.bf16.msra.mxu0 %v1085_v61  ;;  %2791 = vmatpush3.bf16.msra.mxu1 %v1085_v61 }
 0x622   :  { %2768 = vmatprep.subr.bf16.mxu0 %v1086_v27  ;;  %2792 = vmatprep.subr.bf16.mxu1 %v1086_v27 }
 0x625   :  { %2769 = vmatpush3.bf16.msra.mxu0 %v1086_v27  ;;  %2793 = vmatpush3.bf16.msra.mxu1 %v1086_v27 }
 0x626   :  { %2770 = vmatprep.subr.bf16.mxu0 %v1087_v25  ;;  %2794 = vmatprep.subr.bf16.mxu1 %v1087_v25 }
 0x629   :  { %2771 = vmatpush3.bf16.msra.mxu0 %v1087_v25  ;;  %2795 = vmatpush3.bf16.msra.mxu1 %v1087_v25 }
 0x62c   :  { %2773 = vmatmul.mubr.bf16.vlgmr.msra.gmra.mrb[48].mxu0 %v3490_v28  ;;  %2797 = vmatmul.mubr.bf16.vlgmr.msra.gmra.mrb[48].mxu1 %v3492_v29 }
 0x62d   :  { %2776 = vmatprep.mubr.bf16.mxu0 %v3494_v30  ;;  %2800 = vmatprep.mubr.bf16.mxu1 %v3496_v31 }
 0x634   :  { %2777 = vmatmul.mubr.bf16.gmra.mrb[52].mxu0 %v3502_v32  ;;  %2801 = vmatmul.mubr.bf16.gmra.mrb[52].mxu1 %v3504_v33 }
 0x635   :  { %2820 = vmatprep.mubr.bf16.mxu0 %v3433_v49  ;;  %2844 = vmatprep.mubr.bf16.mxu1 %v3435_v50 }
 0x6ff   :  { %v2774_v38 = vpop.f32.mrb[48].mxu0  ;;  %v2798_v39 = vpop.f32.mrb[48].mxu1 }
 0x700   :  { %v1122_v42 = vpop.f32.mrb[49].mxu0  ;;  %v1187_v43 = vpop.f32.mrb[49].mxu1  ;;  %v1131_v48 = vadd.f32 %v2774_v38, %v3520_v37  ;;  %v1196_v51 = vadd.f32 %v2798_v39, %v3524_v41 }
 0x701   :  { %v2775_v46 = vpop.f32.mrb[50].mxu0  ;;  %v2799_v47 = vpop.f32.mrb[50].mxu1  ;;  %v1123_v56 = vadd.f32 %v1122_v42, %v3514_v35  ;;  %v1188_v57 = vadd.f32 %v1187_v43, %v3528_v45 }
 0x702   :  { %v1134_v52 = vadd.f32 %v2775_v46, %v3517_v36  ;;  %v1199_v53 = vadd.f32 %v2799_v47, %v3522_v40  ;;  %v1125_v54 = vpop.f32.mrb[51].mxu0  ;;  %v1190_v55 = vpop.f32.mrb[51].mxu1 }
 0x703   :  { %v1126_v58 = vadd.f32 %v1125_v54, %v3511_v34  ;;  %v1191_v59 = vadd.f32 %v1190_v55, %v3526_v44 }
 0x704   :  { %v1219_v60 = vpack.c.bf16 %v1134_v52, %v1131_v48  ;;  %v1223_v61 = vpack.c.bf16 %v1199_v53, %v1196_v51 }
 0x705   :  { %v1218_v62 = vpack.c.bf16 %v1126_v58, %v1123_v56  ;;  %v1222_v0 = vpack.c.bf16 %v1191_v59, %v1188_v57 }
 0x707   :  { %v2778_v8 = vpop.f32.mrb[52].mxu0  ;;  %v2802_v9 = vpop.f32.mrb[52].mxu1  ;;  %2804 = vmatprep.subr.bf16.mxu0 %v1218_v62  ;;  %2828 = vmatprep.subr.bf16.mxu1 %v1218_v62 }
 0x708   :  { %v1138_v12 = vpop.f32.mrb[53].mxu0  ;;  %v1203_v63 = vpop.f32.mrb[53].mxu1  ;;  %2805 = vmatpush3.bf16.msra.mxu0 %v1218_v62  ;;  %2829 = vmatpush3.bf16.msra.mxu1 %v1218_v62  ;;  %v1147_v14 = vadd.f32 %v2778_v8, %v3548_v7  ;;  %v1212_v15 = vadd.f32 %v2802_v9, %v3552_v11 }
 0x709   :  { %v2779_v6 = vpop.f32.mrb[54].mxu0  ;;  %v2803_v13 = vpop.f32.mrb[54].mxu1  ;;  %2806 = vmatprep.subr.bf16.mxu0 %v1219_v60  ;;  %2830 = vmatprep.subr.bf16.mxu1 %v1219_v60  ;;  %v1139_v19 = vadd.f32 %v1138_v12, %v3542_v3  ;;  %v1204_v22 = vadd.f32 %v1203_v63, %v3558_v4 }
 0x70a   :  { %v1150_v16 = vadd.f32 %v2779_v6, %v3545_v5  ;;  %v1215_v17 = vadd.f32 %v2803_v13, %v3550_v10  ;;  %v1141_v18 = vpop.f32.mrb[55].mxu0  ;;  %v1206_v20 = vpop.f32.mrb[55].mxu1 }
 0x70b   :  { %v1142_v21 = vadd.f32 %v1141_v18, %v3539_v2  ;;  %v1207_v23 = vadd.f32 %v1206_v20, %v3555_v1 }
 0x70c   :  { %v1221_v24 = vpack.c.bf16 %v1150_v16, %v1147_v14  ;;  %v1225_v25 = vpack.c.bf16 %v1215_v17, %v1212_v15  ;;  %2807 = vmatpush3.bf16.msra.mxu0 %v1219_v60  ;;  %2831 = vmatpush3.bf16.msra.mxu1 %v1219_v60 }
 0x70d   :  { %v1220_v26 = vpack.c.bf16 %v1142_v21, %v1139_v19  ;;  %v1224_v27 = vpack.c.bf16 %v1207_v23, %v1204_v22 }
 0x70f   :  { %2808 = vmatprep.subr.bf16.mxu0 %v1220_v26  ;;  %2832 = vmatprep.subr.bf16.mxu1 %v1220_v26 }
 0x710   :  { %2809 = vmatpush3.bf16.msra.mxu0 %v1220_v26  ;;  %2833 = vmatpush3.bf16.msra.mxu1 %v1220_v26  ;;  %v3694_v26 = vld [vmem:[#allocation8] sm:$0xff]  }
 0x711   :  { %2810 = vmatprep.subr.bf16.mxu0 %v1221_v24  ;;  %2834 = vmatprep.subr.bf16.mxu1 %v1221_v24 }
 0x714   :  { %2811 = vmatpush3.bf16.msra.mxu0 %v1221_v24  ;;  %2835 = vmatpush3.bf16.msra.mxu1 %v1221_v24 }
 0x715   :  { %2812 = vmatprep.subr.bf16.mxu0 %v1222_v0  ;;  %2836 = vmatprep.subr.bf16.mxu1 %v1222_v0 }
 0x718   :  { %2813 = vmatpush3.bf16.msra.mxu0 %v1222_v0  ;;  %2837 = vmatpush3.bf16.msra.mxu1 %v1222_v0 }
 0x719   :  { %2814 = vmatprep.subr.bf16.mxu0 %v1223_v61  ;;  %2838 = vmatprep.subr.bf16.mxu1 %v1223_v61 }
 0x71c   :  { %2815 = vmatpush3.bf16.msra.mxu0 %v1223_v61  ;;  %2839 = vmatpush3.bf16.msra.mxu1 %v1223_v61 }
 0x71d   :  { %2816 = vmatprep.subr.bf16.mxu0 %v1224_v27  ;;  %2840 = vmatprep.subr.bf16.mxu1 %v1224_v27 }
 0x720   :  { %2817 = vmatpush3.bf16.msra.mxu0 %v1224_v27  ;;  %2841 = vmatpush3.bf16.msra.mxu1 %v1224_v27  ;;  %v3697_v27 = vld [vmem:[#allocation8 + $0x20] sm:$0xff]  }
 0x721   :  { %2818 = vmatprep.subr.bf16.mxu0 %v1225_v25  ;;  %2842 = vmatprep.subr.bf16.mxu1 %v1225_v25 }
 0x724   :  { %2819 = vmatpush3.bf16.msra.mxu0 %v1225_v25  ;;  %2843 = vmatpush3.bf16.msra.mxu1 %v1225_v25 }
 0x727   :  { %2821 = vmatmul.mubr.bf16.vlgmr.msra.gmra.mrb[56].mxu0 %v3490_v28  ;;  %2845 = vmatmul.mubr.bf16.vlgmr.msra.gmra.mrb[56].mxu1 %v3492_v29 }
 0x728   :  { %2824 = vmatprep.mubr.bf16.mxu0 %v3494_v30  ;;  %2848 = vmatprep.mubr.bf16.mxu1 %v3496_v31 }
 0x72f   :  { %2825 = vmatmul.mubr.bf16.gmra.mrb[60].mxu0 %v3502_v32  ;;  %2849 = vmatmul.mubr.bf16.gmra.mrb[60].mxu1 %v3504_v33 }
 0x730   :  { %2868 = vmatprep.mubr.bf16.mxu0 %v3433_v49  ;;  %2892 = vmatprep.mubr.bf16.mxu1 %v3435_v50 }
 0x7fa   :  { %v2822_v38 = vpop.f32.mrb[56].mxu0  ;;  %v2846_v39 = vpop.f32.mrb[56].mxu1 }
 0x7fb   :  { %v1260_v42 = vpop.f32.mrb[57].mxu0  ;;  %v1325_v43 = vpop.f32.mrb[57].mxu1  ;;  %v1269_v48 = vadd.f32 %v2822_v38, %v3520_v37  ;;  %v1334_v51 = vadd.f32 %v2846_v39, %v3524_v41 }
 0x7fc   :  { %v2823_v46 = vpop.f32.mrb[58].mxu0  ;;  %v2847_v47 = vpop.f32.mrb[58].mxu1  ;;  %v1261_v49 = vadd.f32 %v1260_v42, %v3514_v35  ;;  %v1326_v50 = vadd.f32 %v1325_v43, %v3528_v45 }
 0x7fd   :  { %v1272_v52 = vadd.f32 %v2823_v46, %v3517_v36  ;;  %v1337_v53 = vadd.f32 %v2847_v47, %v3522_v40  ;;  %v1263_v54 = vpop.f32.mrb[59].mxu0  ;;  %v1328_v55 = vpop.f32.mrb[59].mxu1 }
 0x7fe   :  { %v1264_v56 = vadd.f32 %v1263_v54, %v3511_v34  ;;  %v1329_v57 = vadd.f32 %v1328_v55, %v3526_v44 }
 0x7ff   :  { %v1357_v58 = vpack.c.bf16 %v1272_v52, %v1269_v48  ;;  %v1361_v59 = vpack.c.bf16 %v1337_v53, %v1334_v51 }
 0x800   :  { %v1356_v60 = vpack.c.bf16 %v1264_v56, %v1261_v49  ;;  %v1360_v61 = vpack.c.bf16 %v1329_v57, %v1326_v50 }
 0x802   :  { %v2826_v62 = vpop.f32.mrb[60].mxu0  ;;  %v2850_v0 = vpop.f32.mrb[60].mxu1  ;;  %2852 = vmatprep.subr.bf16.mxu0 %v1356_v60  ;;  %2876 = vmatprep.subr.bf16.mxu1 %v1356_v60 }
 0x803   :  { %v1276_v8 = vpop.f32.mrb[61].mxu0  ;;  %v1341_v9 = vpop.f32.mrb[61].mxu1  ;;  %2853 = vmatpush3.bf16.msra.mxu0 %v1356_v60  ;;  %2877 = vmatpush3.bf16.msra.mxu1 %v1356_v60  ;;  %v1285_v6 = vadd.f32 %v2826_v62, %v3548_v7  ;;  %v1350_v13 = vadd.f32 %v2850_v0, %v3552_v11 }
 0x804   :  { %v2827_v12 = vpop.f32.mrb[62].mxu0  ;;  %v2851_v63 = vpop.f32.mrb[62].mxu1  ;;  %2854 = vmatprep.subr.bf16.mxu0 %v1357_v58  ;;  %2878 = vmatprep.subr.bf16.mxu1 %v1357_v58  ;;  %v1277_v18 = vadd.f32 %v1276_v8, %v3542_v3  ;;  %v1342_v20 = vadd.f32 %v1341_v9, %v3558_v4 }
 0x805   :  { %v1288_v14 = vadd.f32 %v2827_v12, %v3545_v5  ;;  %v1353_v15 = vadd.f32 %v2851_v63, %v3550_v10  ;;  %v1279_v16 = vpop.f32.mrb[63].mxu0  ;;  %v1344_v17 = vpop.f32.mrb[63].mxu1 }
 0x806   :  { %v1280_v19 = vadd.f32 %v1279_v16, %v3539_v2  ;;  %v1345_v22 = vadd.f32 %v1344_v17, %v3555_v1 }
 0x807   :  { %v1359_v21 = vpack.c.bf16 %v1288_v14, %v1285_v6  ;;  %v1363_v23 = vpack.c.bf16 %v1353_v15, %v1350_v13  ;;  %2855 = vmatpush3.bf16.msra.mxu0 %v1357_v58  ;;  %2879 = vmatpush3.bf16.msra.mxu1 %v1357_v58 }
 0x808   :  { %v1358_v24 = vpack.c.bf16 %v1280_v19, %v1277_v18  ;;  %v1362_v25 = vpack.c.bf16 %v1345_v22, %v1342_v20  ;;  %v3716_v19 = vld [vmem:[#allocation8 + $0x8] sm:$0xff]  }
 0x809   :  { %v3719_v22 = vld [vmem:[#allocation8 + $0x28] sm:$0xff]  }
 0x80a   :  { %2856 = vmatprep.subr.bf16.mxu0 %v1358_v24  ;;  %2880 = vmatprep.subr.bf16.mxu1 %v1358_v24 }
 0x80b   :  { %2857 = vmatpush3.bf16.msra.mxu0 %v1358_v24  ;;  %2881 = vmatpush3.bf16.msra.mxu1 %v1358_v24  ;;  %v3728_v24 = vld [vmem:[#allocation8 + $0x18] sm:$0xff]  }
 0x80c   :  { %2858 = vmatprep.subr.bf16.mxu0 %v1359_v21  ;;  %2882 = vmatprep.subr.bf16.mxu1 %v1359_v21 }
 0x80f   :  { %2859 = vmatpush3.bf16.msra.mxu0 %v1359_v21  ;;  %2883 = vmatpush3.bf16.msra.mxu1 %v1359_v21  ;;  %v3722_v21 = vld [vmem:[#allocation8 + $0x10] sm:$0xff]  }
 0x810   :  { %2860 = vmatprep.subr.bf16.mxu0 %v1360_v61  ;;  %2884 = vmatprep.subr.bf16.mxu1 %v1360_v61 }
 0x813   :  { %2861 = vmatpush3.bf16.msra.mxu0 %v1360_v61  ;;  %2885 = vmatpush3.bf16.msra.mxu1 %v1360_v61 }
 0x814   :  { %2862 = vmatprep.subr.bf16.mxu0 %v1361_v59  ;;  %2886 = vmatprep.subr.bf16.mxu1 %v1361_v59 }
 0x817   :  { %2863 = vmatpush3.bf16.msra.mxu0 %v1361_v59  ;;  %2887 = vmatpush3.bf16.msra.mxu1 %v1361_v59 }
 0x818   :  { %2864 = vmatprep.subr.bf16.mxu0 %v1362_v25  ;;  %2888 = vmatprep.subr.bf16.mxu1 %v1362_v25 }
 0x81b   :  { %2865 = vmatpush3.bf16.msra.mxu0 %v1362_v25  ;;  %2889 = vmatpush3.bf16.msra.mxu1 %v1362_v25  ;;  %v3731_v25 = vld [vmem:[#allocation8 + $0x38] sm:$0xff]  }
 0x81c   :  { %2866 = vmatprep.subr.bf16.mxu0 %v1363_v23  ;;  %2890 = vmatprep.subr.bf16.mxu1 %v1363_v23 }
 0x81f   :  { %2867 = vmatpush3.bf16.msra.mxu0 %v1363_v23  ;;  %2891 = vmatpush3.bf16.msra.mxu1 %v1363_v23  ;;  %v3725_v23 = vld [vmem:[#allocation8 + $0x30] sm:$0xff]  }
 0x822   :  { %2869 = vmatmul.mubr.bf16.vlgmr.msra.gmra.mrb[64].mxu0 %v3490_v28  ;;  %2893 = vmatmul.mubr.bf16.vlgmr.msra.gmra.mrb[64].mxu1 %v3492_v29 }
 0x823   :  { %2872 = vmatprep.mubr.bf16.mxu0 %v3494_v30  ;;  %2896 = vmatprep.mubr.bf16.mxu1 %v3496_v31 }
 0x82a   :  { %2873 = vmatmul.mubr.bf16.gmra.mrb[68].mxu0 %v3502_v32  ;;  %2897 = vmatmul.mubr.bf16.gmra.mrb[68].mxu1 %v3504_v33 }
 0x82b   :  { %2916 = vmatprep.mubr.bf16.mxu0 %v3694_v26  ;;  %2940 = vmatprep.mubr.bf16.mxu1 %v3697_v27 }
 0x8f5   :  { %v2870_v38 = vpop.f32.mrb[64].mxu0  ;;  %v2894_v28 = vpop.f32.mrb[64].mxu1 }
 0x8f6   :  { %v1398_v39 = vpop.f32.mrb[65].mxu0  ;;  %v1463_v29 = vpop.f32.mrb[65].mxu1  ;;  %v1407_v31 = vadd.f32 %v2870_v38, %v3520_v37  ;;  %v1472_v32 = vadd.f32 %v2894_v28, %v3524_v41 }
 0x8f7   :  { %v2871_v42 = vpop.f32.mrb[66].mxu0  ;;  %v2895_v30 = vpop.f32.mrb[66].mxu1  ;;  %v1399_v48 = vadd.f32 %v1398_v39, %v3514_v35  ;;  %v1464_v51 = vadd.f32 %v1463_v29, %v3528_v45 }
 0x8f8   :  { %v1410_v33 = vadd.f32 %v2871_v42, %v3517_v36  ;;  %v1475_v43 = vadd.f32 %v2895_v30, %v3522_v40  ;;  %v1401_v46 = vpop.f32.mrb[67].mxu0  ;;  %v1466_v47 = vpop.f32.mrb[67].mxu1 }
 0x8f9   :  { %v1402_v52 = vadd.f32 %v1401_v46, %v3511_v34  ;;  %v1467_v53 = vadd.f32 %v1466_v47, %v3526_v44 }
 0x8fa   :  { %v1495_v54 = vpack.c.bf16 %v1410_v33, %v1407_v31  ;;  %v1499_v55 = vpack.c.bf16 %v1475_v43, %v1472_v32 }
 0x8fb   :  { %v1494_v49 = vpack.c.bf16 %v1402_v52, %v1399_v48  ;;  %v1498_v50 = vpack.c.bf16 %v1467_v53, %v1464_v51 }
 0x8fd   :  { %v2874_v56 = vpop.f32.mrb[68].mxu0  ;;  %v2898_v57 = vpop.f32.mrb[68].mxu1  ;;  %2900 = vmatprep.subr.bf16.mxu0 %v1494_v49  ;;  %2924 = vmatprep.subr.bf16.mxu1 %v1494_v49 }
 0x8fe   :  { %v1414_v58 = vpop.f32.mrb[69].mxu0  ;;  %v1479_v59 = vpop.f32.mrb[69].mxu1  ;;  %2901 = vmatpush3.bf16.msra.mxu0 %v1494_v49  ;;  %2925 = vmatpush3.bf16.msra.mxu1 %v1494_v49  ;;  %v1423_v62 = vadd.f32 %v2874_v56, %v3548_v7  ;;  %v1488_v0 = vadd.f32 %v2898_v57, %v3552_v11 }
 0x8ff   :  { %v2875_v60 = vpop.f32.mrb[70].mxu0  ;;  %v2899_v61 = vpop.f32.mrb[70].mxu1  ;;  %2902 = vmatprep.subr.bf16.mxu0 %v1495_v54  ;;  %2926 = vmatprep.subr.bf16.mxu1 %v1495_v54  ;;  %v1415_v6 = vadd.f32 %v1414_v58, %v3542_v3  ;;  %v1480_v13 = vadd.f32 %v1479_v59, %v3558_v4 }
 0x900   :  { %v1426_v8 = vadd.f32 %v2875_v60, %v3545_v5  ;;  %v1491_v9 = vadd.f32 %v2899_v61, %v3550_v10  ;;  %v1417_v12 = vpop.f32.mrb[71].mxu0  ;;  %v1482_v63 = vpop.f32.mrb[71].mxu1 }
 0x901   :  { %v1418_v14 = vadd.f32 %v1417_v12, %v3539_v2  ;;  %v1483_v15 = vadd.f32 %v1482_v63, %v3555_v1 }
 0x902   :  { %v1497_v16 = vpack.c.bf16 %v1426_v8, %v1423_v62  ;;  %v1501_v17 = vpack.c.bf16 %v1491_v9, %v1488_v0  ;;  %2903 = vmatpush3.bf16.msra.mxu0 %v1495_v54  ;;  %2927 = vmatpush3.bf16.msra.mxu1 %v1495_v54 }
 0x903   :  { %v1496_v18 = vpack.c.bf16 %v1418_v14, %v1415_v6  ;;  %v1500_v20 = vpack.c.bf16 %v1483_v15, %v1480_v13 }
 0x905   :  { %2904 = vmatprep.subr.bf16.mxu0 %v1496_v18  ;;  %2928 = vmatprep.subr.bf16.mxu1 %v1496_v18 }
 0x906   :  { %2905 = vmatpush3.bf16.msra.mxu0 %v1496_v18  ;;  %2929 = vmatpush3.bf16.msra.mxu1 %v1496_v18 }
 0x907   :  { %2906 = vmatprep.subr.bf16.mxu0 %v1497_v16  ;;  %2930 = vmatprep.subr.bf16.mxu1 %v1497_v16 }
 0x90a   :  { %2907 = vmatpush3.bf16.msra.mxu0 %v1497_v16  ;;  %2931 = vmatpush3.bf16.msra.mxu1 %v1497_v16 }
 0x90b   :  { %2908 = vmatprep.subr.bf16.mxu0 %v1498_v50  ;;  %2932 = vmatprep.subr.bf16.mxu1 %v1498_v50 }
 0x90e   :  { %2909 = vmatpush3.bf16.msra.mxu0 %v1498_v50  ;;  %2933 = vmatpush3.bf16.msra.mxu1 %v1498_v50 }
 0x90f   :  { %2910 = vmatprep.subr.bf16.mxu0 %v1499_v55  ;;  %2934 = vmatprep.subr.bf16.mxu1 %v1499_v55 }
 0x912   :  { %2911 = vmatpush3.bf16.msra.mxu0 %v1499_v55  ;;  %2935 = vmatpush3.bf16.msra.mxu1 %v1499_v55 }
 0x913   :  { %2912 = vmatprep.subr.bf16.mxu0 %v1500_v20  ;;  %2936 = vmatprep.subr.bf16.mxu1 %v1500_v20 }
 0x916   :  { %2913 = vmatpush3.bf16.msra.mxu0 %v1500_v20  ;;  %2937 = vmatpush3.bf16.msra.mxu1 %v1500_v20 }
 0x917   :  { %2914 = vmatprep.subr.bf16.mxu0 %v1501_v17  ;;  %2938 = vmatprep.subr.bf16.mxu1 %v1501_v17 }
 0x91a   :  { %2915 = vmatpush3.bf16.msra.mxu0 %v1501_v17  ;;  %2939 = vmatpush3.bf16.msra.mxu1 %v1501_v17 }
 0x91d   :  { %2917 = vmatmul.mubr.bf16.vlgmr.msra.gmra.mrb[72].mxu0 %v3716_v19  ;;  %2941 = vmatmul.mubr.bf16.vlgmr.msra.gmra.mrb[72].mxu1 %v3719_v22 }
 0x91e   :  { %2920 = vmatprep.mubr.bf16.mxu0 %v3722_v21  ;;  %2944 = vmatprep.mubr.bf16.mxu1 %v3725_v23 }
 0x925   :  { %2921 = vmatmul.mubr.bf16.gmra.mrb[76].mxu0 %v3728_v24  ;;  %2945 = vmatmul.mubr.bf16.gmra.mrb[76].mxu1 %v3731_v25 }
 0x926   :  { %2964 = vmatprep.mubr.bf16.mxu0 %v3694_v26  ;;  %2988 = vmatprep.mubr.bf16.mxu1 %v3697_v27 }
 0x9f0   :  { %v2918_v38 = vpop.f32.mrb[72].mxu0  ;;  %v2942_v28 = vpop.f32.mrb[72].mxu1 }
 0x9f1   :  { %v1536_v39 = vpop.f32.mrb[73].mxu0  ;;  %v1601_v29 = vpop.f32.mrb[73].mxu1  ;;  %v1545_v31 = vadd.f32 %v2918_v38, %v3520_v37  ;;  %v1610_v32 = vadd.f32 %v2942_v28, %v3524_v41 }
 0x9f2   :  { %v2919_v42 = vpop.f32.mrb[74].mxu0  ;;  %v2943_v30 = vpop.f32.mrb[74].mxu1  ;;  %v1537_v48 = vadd.f32 %v1536_v39, %v3514_v35  ;;  %v1602_v51 = vadd.f32 %v1601_v29, %v3528_v45 }
 0x9f3   :  { %v1548_v33 = vadd.f32 %v2919_v42, %v3517_v36  ;;  %v1613_v43 = vadd.f32 %v2943_v30, %v3522_v40  ;;  %v1539_v46 = vpop.f32.mrb[75].mxu0  ;;  %v1604_v47 = vpop.f32.mrb[75].mxu1 }
 0x9f4   :  { %v1540_v52 = vadd.f32 %v1539_v46, %v3511_v34  ;;  %v1605_v53 = vadd.f32 %v1604_v47, %v3526_v44 }
 0x9f5   :  { %v1633_v54 = vpack.c.bf16 %v1548_v33, %v1545_v31  ;;  %v1637_v55 = vpack.c.bf16 %v1613_v43, %v1610_v32 }
 0x9f6   :  { %v1632_v49 = vpack.c.bf16 %v1540_v52, %v1537_v48  ;;  %v1636_v50 = vpack.c.bf16 %v1605_v53, %v1602_v51 }
 0x9f8   :  { %v2922_v56 = vpop.f32.mrb[76].mxu0  ;;  %v2946_v57 = vpop.f32.mrb[76].mxu1  ;;  %2948 = vmatprep.subr.bf16.mxu0 %v1632_v49  ;;  %2972 = vmatprep.subr.bf16.mxu1 %v1632_v49 }
 0x9f9   :  { %v1552_v58 = vpop.f32.mrb[77].mxu0  ;;  %v1617_v59 = vpop.f32.mrb[77].mxu1  ;;  %2949 = vmatpush3.bf16.msra.mxu0 %v1632_v49  ;;  %2973 = vmatpush3.bf16.msra.mxu1 %v1632_v49  ;;  %v1561_v62 = vadd.f32 %v2922_v56, %v3548_v7  ;;  %v1626_v0 = vadd.f32 %v2946_v57, %v3552_v11 }
 0x9fa   :  { %v2923_v60 = vpop.f32.mrb[78].mxu0  ;;  %v2947_v61 = vpop.f32.mrb[78].mxu1  ;;  %2950 = vmatprep.subr.bf16.mxu0 %v1633_v54  ;;  %2974 = vmatprep.subr.bf16.mxu1 %v1633_v54  ;;  %v1553_v6 = vadd.f32 %v1552_v58, %v3542_v3  ;;  %v1618_v13 = vadd.f32 %v1617_v59, %v3558_v4 }
 0x9fb   :  { %v1564_v8 = vadd.f32 %v2923_v60, %v3545_v5  ;;  %v1629_v9 = vadd.f32 %v2947_v61, %v3550_v10  ;;  %v1555_v12 = vpop.f32.mrb[79].mxu0  ;;  %v1620_v63 = vpop.f32.mrb[79].mxu1 }
 0x9fc   :  { %v1556_v14 = vadd.f32 %v1555_v12, %v3539_v2  ;;  %v1621_v15 = vadd.f32 %v1620_v63, %v3555_v1 }
 0x9fd   :  { %v1635_v16 = vpack.c.bf16 %v1564_v8, %v1561_v62  ;;  %v1639_v17 = vpack.c.bf16 %v1629_v9, %v1626_v0  ;;  %2951 = vmatpush3.bf16.msra.mxu0 %v1633_v54  ;;  %2975 = vmatpush3.bf16.msra.mxu1 %v1633_v54 }
 0x9fe   :  { %v1634_v18 = vpack.c.bf16 %v1556_v14, %v1553_v6  ;;  %v1638_v20 = vpack.c.bf16 %v1621_v15, %v1618_v13 }
 0xa00   :  { %2952 = vmatprep.subr.bf16.mxu0 %v1634_v18  ;;  %2976 = vmatprep.subr.bf16.mxu1 %v1634_v18 }
 0xa01   :  { %2953 = vmatpush3.bf16.msra.mxu0 %v1634_v18  ;;  %2977 = vmatpush3.bf16.msra.mxu1 %v1634_v18  ;;  %v1908_v18 = vlaneseq }
 0xa02   :  { %2954 = vmatprep.subr.bf16.mxu0 %v1635_v16  ;;  %2978 = vmatprep.subr.bf16.mxu1 %v1635_v16 }
 0xa05   :  { %2955 = vmatpush3.bf16.msra.mxu0 %v1635_v16  ;;  %2979 = vmatpush3.bf16.msra.mxu1 %v1635_v16 }
 0xa06   :  { %2956 = vmatprep.subr.bf16.mxu0 %v1636_v50  ;;  %2980 = vmatprep.subr.bf16.mxu1 %v1636_v50 }
 0xa09   :  { %2957 = vmatpush3.bf16.msra.mxu0 %v1636_v50  ;;  %2981 = vmatpush3.bf16.msra.mxu1 %v1636_v50 }
 0xa0a   :  { %2958 = vmatprep.subr.bf16.mxu0 %v1637_v55  ;;  %2982 = vmatprep.subr.bf16.mxu1 %v1637_v55 }
 0xa0d   :  { %2959 = vmatpush3.bf16.msra.mxu0 %v1637_v55  ;;  %2983 = vmatpush3.bf16.msra.mxu1 %v1637_v55 }
 0xa0e   :  { %2960 = vmatprep.subr.bf16.mxu0 %v1638_v20  ;;  %2984 = vmatprep.subr.bf16.mxu1 %v1638_v20 }
 0xa11   :  { %2961 = vmatpush3.bf16.msra.mxu0 %v1638_v20  ;;  %2985 = vmatpush3.bf16.msra.mxu1 %v1638_v20  ;;  %v3782_v20 = vand.u32 127, %v1908_v18 }
 0xa12   :  { %2962 = vmatprep.subr.bf16.mxu0 %v1639_v17  ;;  %2986 = vmatprep.subr.bf16.mxu1 %v1639_v17 }
 0xa13   :  { %vm1910_vm0 = vcmp.lt.s32.totalorder %v3782_v20, 8 }
 0xa15   :  { %2963 = vmatpush3.bf16.msra.mxu0 %v1639_v17  ;;  %2987 = vmatpush3.bf16.msra.mxu1 %v1639_v17 }
 0xa18   :  { %2965 = vmatmul.mubr.bf16.vlgmr.msra.gmra.mrb[80].mxu0 %v3716_v19  ;;  %2989 = vmatmul.mubr.bf16.vlgmr.msra.gmra.mrb[80].mxu1 %v3719_v22 }
 0xa19   :  { %2968 = vmatprep.mubr.bf16.mxu0 %v3722_v21  ;;  %2992 = vmatprep.mubr.bf16.mxu1 %v3725_v23 }
 0xa20   :  { %2969 = vmatmul.mubr.bf16.gmra.mrb[84].mxu0 %v3728_v24  ;;  %2993 = vmatmul.mubr.bf16.gmra.mrb[84].mxu1 %v3731_v25 }
 0xa21   :  { %3012 = vmatprep.mubr.bf16.mxu0 %v3694_v26  ;;  %3036 = vmatprep.mubr.bf16.mxu1 %v3697_v27 }
 0xaeb   :  { %v2966_v38 = vpop.f32.mrb[80].mxu0  ;;  %v2990_v28 = vpop.f32.mrb[80].mxu1 }
 0xaec   :  { %v1674_v39 = vpop.f32.mrb[81].mxu0  ;;  %v1739_v29 = vpop.f32.mrb[81].mxu1  ;;  %v1683_v31 = vadd.f32 %v2966_v38, %v3520_v37  ;;  %v1748_v32 = vadd.f32 %v2990_v28, %v3524_v41 }
 0xaed   :  { %v2967_v42 = vpop.f32.mrb[82].mxu0  ;;  %v2991_v30 = vpop.f32.mrb[82].mxu1  ;;  %v1675_v26 = vadd.f32 %v1674_v39, %v3514_v35  ;;  %v1740_v27 = vadd.f32 %v1739_v29, %v3528_v45 }
 0xaee   :  { %v1686_v33 = vadd.f32 %v2967_v42, %v3517_v36  ;;  %v1751_v43 = vadd.f32 %v2991_v30, %v3522_v40  ;;  %v1677_v46 = vpop.f32.mrb[83].mxu0  ;;  %v1742_v47 = vpop.f32.mrb[83].mxu1 }
 0xaef   :  { %v1678_v48 = vadd.f32 %v1677_v46, %v3511_v34  ;;  %v1743_v51 = vadd.f32 %v1742_v47, %v3526_v44 }
 0xaf0   :  { %v1771_v52 = vpack.c.bf16 %v1686_v33, %v1683_v31  ;;  %v1775_v53 = vpack.c.bf16 %v1751_v43, %v1748_v32 }
 0xaf1   :  { %v1770_v54 = vpack.c.bf16 %v1678_v48, %v1675_v26  ;;  %v1774_v55 = vpack.c.bf16 %v1743_v51, %v1740_v27 }
 0xaf3   :  { %v2970_v49 = vpop.f32.mrb[84].mxu0  ;;  %v2994_v50 = vpop.f32.mrb[84].mxu1  ;;  %2996 = vmatprep.subr.bf16.mxu0 %v1770_v54  ;;  %3020 = vmatprep.subr.bf16.mxu1 %v1770_v54 }
 0xaf4   :  { %v1690_v56 = vpop.f32.mrb[85].mxu0  ;;  %v1755_v57 = vpop.f32.mrb[85].mxu1  ;;  %2997 = vmatpush3.bf16.msra.mxu0 %v1770_v54  ;;  %3021 = vmatpush3.bf16.msra.mxu1 %v1770_v54  ;;  %v1699_v60 = vadd.f32 %v2970_v49, %v3548_v7  ;;  %v1764_v61 = vadd.f32 %v2994_v50, %v3552_v11 }
 0xaf5   :  { %v2971_v58 = vpop.f32.mrb[86].mxu0  ;;  %v2995_v59 = vpop.f32.mrb[86].mxu1  ;;  %2998 = vmatprep.subr.bf16.mxu0 %v1771_v52  ;;  %3022 = vmatprep.subr.bf16.mxu1 %v1771_v52  ;;  %v1691_v12 = vadd.f32 %v1690_v56, %v3542_v3  ;;  %v1756_v63 = vadd.f32 %v1755_v57, %v3558_v4 }
 0xaf6   :  { %v1702_v62 = vadd.f32 %v2971_v58, %v3545_v5  ;;  %v1767_v0 = vadd.f32 %v2995_v59, %v3550_v10  ;;  %v1693_v8 = vpop.f32.mrb[87].mxu0  ;;  %v1758_v9 = vpop.f32.mrb[87].mxu1 }
 0xaf7   :  { %v1694_v6 = vadd.f32 %v1693_v8, %v3539_v2  ;;  %v1759_v13 = vadd.f32 %v1758_v9, %v3555_v1 }
 0xaf8   :  { %v1773_v14 = vpack.c.bf16 %v1702_v62, %v1699_v60  ;;  %v1777_v15 = vpack.c.bf16 %v1767_v0, %v1764_v61  ;;  %2999 = vmatpush3.bf16.msra.mxu0 %v1771_v52  ;;  %3023 = vmatpush3.bf16.msra.mxu1 %v1771_v52 }
 0xaf9   :  { %v1772_v16 = vpack.c.bf16 %v1694_v6, %v1691_v12  ;;  %v1776_v17 = vpack.c.bf16 %v1759_v13, %v1756_v63 }
 0xafb   :  { %3000 = vmatprep.subr.bf16.mxu0 %v1772_v16  ;;  %3024 = vmatprep.subr.bf16.mxu1 %v1772_v16 }
 0xafc   :  { %3001 = vmatpush3.bf16.msra.mxu0 %v1772_v16  ;;  %3025 = vmatpush3.bf16.msra.mxu1 %v1772_v16 }
 0xafd   :  { %3002 = vmatprep.subr.bf16.mxu0 %v1773_v14  ;;  %3026 = vmatprep.subr.bf16.mxu1 %v1773_v14 }
 0xb00   :  { %3003 = vmatpush3.bf16.msra.mxu0 %v1773_v14  ;;  %3027 = vmatpush3.bf16.msra.mxu1 %v1773_v14 }
 0xb01   :  { %3004 = vmatprep.subr.bf16.mxu0 %v1774_v55  ;;  %3028 = vmatprep.subr.bf16.mxu1 %v1774_v55 }
 0xb04   :  { %3005 = vmatpush3.bf16.msra.mxu0 %v1774_v55  ;;  %3029 = vmatpush3.bf16.msra.mxu1 %v1774_v55 }
 0xb05   :  { %3006 = vmatprep.subr.bf16.mxu0 %v1775_v53  ;;  %3030 = vmatprep.subr.bf16.mxu1 %v1775_v53 }
 0xb08   :  { %3007 = vmatpush3.bf16.msra.mxu0 %v1775_v53  ;;  %3031 = vmatpush3.bf16.msra.mxu1 %v1775_v53 }
 0xb09   :  { %3008 = vmatprep.subr.bf16.mxu0 %v1776_v17  ;;  %3032 = vmatprep.subr.bf16.mxu1 %v1776_v17 }
 0xb0c   :  { %3009 = vmatpush3.bf16.msra.mxu0 %v1776_v17  ;;  %3033 = vmatpush3.bf16.msra.mxu1 %v1776_v17 }
 0xb0d   :  { %3010 = vmatprep.subr.bf16.mxu0 %v1777_v15  ;;  %3034 = vmatprep.subr.bf16.mxu1 %v1777_v15 }
 0xb10   :  { %3011 = vmatpush3.bf16.msra.mxu0 %v1777_v15  ;;  %3035 = vmatpush3.bf16.msra.mxu1 %v1777_v15 }
 0xb13   :  { %3013 = vmatmul.mubr.bf16.vlgmr.msra.gmra.mrb[88].mxu0 %v3716_v19  ;;  %3037 = vmatmul.mubr.bf16.vlgmr.msra.gmra.mrb[88].mxu1 %v3719_v22 }
 0xb14   :  { %3016 = vmatprep.mubr.bf16.mxu0 %v3722_v21  ;;  %3040 = vmatprep.mubr.bf16.mxu1 %v3725_v23 }
 0xb1b   :  { %3017 = vmatmul.mubr.bf16.gmra.mrb[92].mxu0 %v3728_v24  ;;  %3041 = vmatmul.mubr.bf16.gmra.mrb[92].mxu1 %v3731_v25 }
 0xbe6   :  { %v3014_v38 = vpop.f32.mrb[88].mxu0  ;;  %v3038_v28 = vpop.f32.mrb[88].mxu1 }
 0xbe7   :  { %v3786_v39 = vadd.f32 %v3014_v38, %v3520_v37  ;;  %v3789_v19 = vadd.f32 %v3038_v28, %v3524_v41  ;;  %v1812_v22 = vpop.f32.mrb[89].mxu0  ;;  %v1877_v21 = vpop.f32.mrb[89].mxu1 }
 0xbe8   :  { %v3015_v23 = vpop.f32.mrb[90].mxu0  ;;  %v3039_v29 = vpop.f32.mrb[90].mxu1  ;;  %v3792_v24 = vadd.f32 %v1812_v22, %v3514_v35  ;;  %v3804_v31 = vadd.f32 %v1877_v21, %v3528_v45 }
 0xbe9   :  { %v3795_v25 = vadd.f32 %v3015_v23, %v3517_v36  ;;  %v1815_v42 = vpop.f32.mrb[91].mxu0  ;;  %v1880_v30 = vpop.f32.mrb[91].mxu1  ;;  %v1921_v37 = vsel %vm1910_vm0, %v3789_v19, -1e+30  ;;  %v1913_v41 = vsel %vm1910_vm0, %v3786_v39, -1e+30  ;;  %v3807_v35 = vadd.f32 %v3039_v29, %v3522_v40 }
 0xbea   :  { %1947 = vmax.xlane.f32.xlu0 %v1921_v37  ;;  %1931 = vmax.xlane.f32.xlu1 %v1913_v41  ;;  %v3815_v32 = vsel %vm1910_vm0, %v3792_v24, -1e+30  ;;  %v3819_v40 = vadd.f32 %v1815_v42, %v3511_v34  ;;  %v3822_v27 = vadd.f32 %v1880_v30, %v3526_v44  ;;  %v1919_v53 = vsel %vm1910_vm0, %v3804_v31, -1e+30 }
 0xbeb   :  { %v1914_v36 = vsel %vm1910_vm0, %v3795_v25, -1e+30  ;;  %v1922_v52 = vsel %vm1910_vm0, %v3807_v35, -1e+30 }
 0xbec   :  { %v1920_v44 = vsel %vm1910_vm0, %v3822_v27, -1e+30  ;;  %v1912_v55 = vsel %vm1910_vm0, %v3819_v40, -1e+30 }
 0xbee   :  { %v3042_v33 = vpop.f32.mrb[92].mxu1  ;;  %1933 = vmax.xlane.f32.xlu1 %v1914_v36  ;;  %v3018_v43 = vpop.f32.mrb[92].mxu0  ;;  %1927 = vmax.xlane.f32.xlu0 %v3815_v32 }
 0xbef   :  { %v1828_v46 = vpop.f32.mrb[93].mxu0  ;;  %v1893_v45 = vpop.f32.mrb[93].mxu1  ;;  %v3831_v54 = vadd.f32 %v3018_v43, %v3548_v7 }
 0xbf0   :  { %v3019_v47 = vpop.f32.mrb[94].mxu0  ;;  %v3043_v26 = vpop.f32.mrb[94].mxu1  ;;  %v3843_v49 = vadd.f32 %v1828_v46, %v3542_v3  ;;  %v3858_v56 = vadd.f32 %v1893_v45, %v3558_v4  ;;  %v3876_v4 = vadd.f32 %v3042_v33, %v3552_v11 }
 0xbf1   :  { %v1831_v48 = vpop.f32.mrb[95].mxu0  ;;  %v1896_v51 = vpop.f32.mrb[95].mxu1  ;;  %v3834_v34 = vadd.f32 %v3019_v47, %v3545_v5  ;;  %v1917_v7 = vsel %vm1910_vm0, %v3831_v54, -1e+30 }
 0xbf2   :  { %1949 = vmax.xlane.f32.xlu1 %v1922_v52  ;;  %1943 = vmax.xlane.f32.xlu0 %v1919_v53  ;;  %v3846_v50 = vadd.f32 %v1831_v48, %v3539_v2  ;;  %v3861_v3 = vadd.f32 %v1896_v51, %v3555_v1  ;;  %v3871_v57 = vsel %vm1910_vm0, %v3843_v49, -1e+30  ;;  %v3879_v1 = vadd.f32 %v3043_v26, %v3550_v10 }
 0xbf3   :  { %v3851_v5 = vsel %vm1910_vm0, %v3834_v34, -1e+30  ;;  %v3889_v59 = vsel %vm1910_vm0, %v3858_v56, -1e+30  ;;  %v3901_v10 = vsel %vm1910_vm0, %v3876_v4, -1e+30 }
 0xbf4   :  { %v3866_v2 = vsel %vm1910_vm0, %v3846_v50, -1e+30  ;;  %v3884_v58 = vsel %vm1910_vm0, %v3861_v3, -1e+30  ;;  %v3896_v11 = vsel %vm1910_vm0, %v3879_v1, -1e+30 }
 0xbf6   :  { %1945 = vmax.xlane.f32.xlu1 %v1920_v44  ;;  %1929 = vmax.xlane.f32.xlu0 %v1912_v55 }
 0xbfa   :  { %1941 = vmax.xlane.f32.xlu1 %v3851_v5  ;;  %1939 = vmax.xlane.f32.xlu0 %v1917_v7 }
 0xbfe   :  { %1937 = vmax.xlane.f32.xlu1 %v3866_v2  ;;  %1935 = vmax.xlane.f32.xlu0 %v3871_v57 }
 0xc02   :  { %1953 = vmax.xlane.f32.xlu1 %v3884_v58  ;;  %1951 = vmax.xlane.f32.xlu0 %v3889_v59 }
 0xc06   :  { %1957 = vmax.xlane.f32.xlu1 %v3896_v11  ;;  %1955 = vmax.xlane.f32.xlu0 %v3901_v10 }
 0xc77   :  { %v3905_v60 = vpop.xlane.xlu0 %1947  ;;  %v3907_v61 = vpop.xlane.xlu1 %1931 }
 0xc78   :  { %v1961_v62 = vsub.f32 %v1913_v41, %v3907_v61  ;;  %v1969_v0 = vsub.f32 %v1921_v37, %v3905_v60 }
 0xc7a   :  { %v1979_v8 = vmul.f32 1.442695, %v1961_v62  ;;  %v1995_v6 = vmul.f32 1.442695, %v1969_v0 }
 0xc7b   :  { %v3911_v9 = vpop.xlane.xlu1 %1933  ;;  %v3913_v12 = vpop.xlane.xlu0 %1927 }
 0xc7c   :  { %v1962_v63 = vsub.f32 %v1914_v36, %v3911_v9  ;;  %3125 = vpow2.f32 %v1979_v8  ;;  %v1959_v13 = vsub.f32 %v3815_v32, %v3913_v12 }
 0xc7e   :  { %v1981_v14 = vmul.f32 1.442695, %v1962_v63  ;;  %v1975_v20 = vmul.f32 1.442695, %v1959_v13 }
 0xc7f   :  { %v3918_v15 = vpop.xlane.xlu1 %1949  ;;  %v3920_v16 = vpop.xlane.xlu0 %1943 }
 0xc80   :  { %3127 = vpow2.f32 %v1981_v14  ;;  %v1970_v17 = vsub.f32 %v1922_v52, %v3918_v15  ;;  %v1967_v18 = vsub.f32 %v1919_v53, %v3920_v16 }
 0xc81   :  { %3129 = vpow2.f32 %v1995_v6 }
 0xc82   :  { %v1997_v38 = vmul.f32 1.442695, %v1970_v17  ;;  %v1991_v21 = vmul.f32 1.442695, %v1967_v18 }
 0xc83   :  { %v3924_v28 = vpop.xlane.xlu1 %1945  ;;  %v3926_v22 = vpop.xlane.xlu0 %1929 }
 0xc84   :  { %3131 = vpow2.f32 %v1997_v38  ;;  %v1968_v23 = vsub.f32 %v1920_v44, %v3924_v28  ;;  %v1960_v29 = vsub.f32 %v1912_v55, %v3926_v22 }
 0xc85   :  { %3133 = vpow2.f32 %v1975_v20 }
 0xc86   :  { %v1977_v42 = vmul.f32 1.442695, %v1960_v29  ;;  %v3126_v30 = vpop.eup %3125  ;;  %3135 = vpow2.f32 %v1991_v21  ;;  %v1993_v36 = vmul.f32 1.442695, %v1968_v23 }
 0xc87   :  { %v3930_v37 = vpop.xlane.xlu1 %1941  ;;  %v3932_v41 = vpop.xlane.xlu0 %1939  ;;  %2011 = vadd.xlane.f32.xlu0 %v3126_v30 }
 0xc88   :  { %v1966_v32 = vsub.f32 %v3851_v5, %v3930_v37  ;;  %v1965_v33 = vsub.f32 %v1917_v7, %v3932_v41  ;;  %3137 = vpow2.f32 %v1977_v42 }
 0xc89   :  { %3139 = vpow2.f32 %v1993_v36 }
 0xc8a   :  { %v3128_v43 = vpop.eup %3127  ;;  %v1987_v46 = vmul.f32 1.442695, %v1965_v33  ;;  %v1989_v48 = vmul.f32 1.442695, %v1966_v32 }
 0xc8b   :  { %v3130_v45 = vpop.eup %3129  ;;  %2013 = vadd.xlane.f32.xlu1 %v3128_v43  ;;  %v3937_v47 = vpop.xlane.xlu1 %1937 }
 0xc8c   :  { %v3939_v26 = vpop.xlane.xlu0 %1935  ;;  %v1964_v51 = vsub.f32 %v3866_v2, %v3937_v47  ;;  %2027 = vadd.xlane.f32.xlu0 %v3130_v45  ;;  %3141 = vpow2.f32 %v1987_v46 }
 0xc8d   :  { %v1963_v52 = vsub.f32 %v3871_v57, %v3939_v26  ;;  %3143 = vpow2.f32 %v1989_v48  ;;  %v2073_v48 = vsub.f32 %v3786_v39, %v3907_v61 }
 0xc8e   :  { %v3132_v53 = vpop.eup %3131  ;;  %v1985_v62 = vmul.f32 1.442695, %v1964_v51 }
 0xc8f   :  { %v1983_v44 = vmul.f32 1.442695, %v1963_v52  ;;  %v3134_v55 = vpop.eup %3133  ;;  %2029 = vadd.xlane.f32.xlu1 %v3132_v53  ;;  %v3945_v5 = vpop.xlane.xlu1 %1953 }
 0xc90   :  { %v3947_v7 = vpop.xlane.xlu0 %1951  ;;  %v1972_v0 = vsub.f32 %v3884_v58, %v3945_v5  ;;  %2007 = vadd.xlane.f32.xlu0 %v3134_v55  ;;  %v3136_v57 = vpop.eup %3135 }
 0xc91   :  { %v1971_v2 = vsub.f32 %v3889_v59, %v3947_v7  ;;  %3145 = vpow2.f32 %v1983_v44 }
 0xc92   :  { %v3138_v63 = vpop.eup %3137  ;;  %3147 = vpow2.f32 %v1985_v62  ;;  %v2001_v14 = vmul.f32 1.442695, %v1972_v0  ;;  %v2074_v0 = vsub.f32 %v3795_v25, %v3911_v9  ;;  %v2071_v25 = vsub.f32 %v3792_v24, %v3913_v12 }
 0xc93   :  { %v1999_v8 = vmul.f32 1.442695, %v1971_v2  ;;  %v3953_v6 = vpop.xlane.xlu1 %1957  ;;  %2009 = vadd.xlane.f32.xlu1 %v3138_v63  ;;  %v3140_v59 = vpop.eup %3139  ;;  %v2079_v24 = vsub.f32 %v3804_v31, %v3920_v16 }
 0xc94   :  { %v3955_v13 = vpop.xlane.xlu0 %1955  ;;  %2023 = vadd.xlane.f32.xlu0 %v3136_v57  ;;  %v1974_v58 = vsub.f32 %v3896_v11, %v3953_v6  ;;  %v2081_v57 = vsub.f32 %v3789_v19, %v3905_v60 }
 0xc95   :  { %v1973_v17 = vsub.f32 %v3901_v10, %v3955_v13  ;;  %3149 = vpow2.f32 %v1999_v8 }
 0xc96   :  { %v3142_v20 = vpop.eup %3141  ;;  %3151 = vpow2.f32 %v2001_v14  ;;  %v2005_v38 = vmul.f32 1.442695, %v1974_v58 }
 0xc97   :  { %v2003_v18 = vmul.f32 1.442695, %v1973_v17  ;;  %2025 = vadd.xlane.f32.xlu1 %v3140_v59  ;;  %v3144_v21 = vpop.eup %3143  ;;  %v2082_v59 = vsub.f32 %v3807_v35, %v3918_v15 }
 0xc98   :  { %2019 = vadd.xlane.f32.xlu0 %v3142_v20 }
 0xc99   :  { %3153 = vpow2.f32 %v2003_v18 }
 0xc9a   :  { %3155 = vpow2.f32 %v2005_v38 }
 0xc9b   :  { %v3146_v23 = vpop.eup %3145  ;;  %2021 = vadd.xlane.f32.xlu1 %v3144_v21 }
 0xc9c   :  { %2015 = vadd.xlane.f32.xlu0 %v3146_v23  ;;  %v3148_v29 = vpop.eup %3147 }
 0xc9f   :  { %v3150_v42 = vpop.eup %3149  ;;  %2017 = vadd.xlane.f32.xlu1 %v3148_v29  ;;  %v2072_v29 = vsub.f32 %v3819_v40, %v3926_v22 }
 0xca0   :  { %2031 = vadd.xlane.f32.xlu0 %v3150_v42  ;;  %v3152_v10 = vpop.eup %3151 }
 0xca3   :  { %v3154_v30 = vpop.eup %3153  ;;  %2033 = vadd.xlane.f32.xlu1 %v3152_v10 }
 0xca4   :  { %2035 = vadd.xlane.f32.xlu0 %v3154_v30  ;;  %v3156_v11 = vpop.eup %3155 }
 0xca7   :  { %2037 = vadd.xlane.f32.xlu1 %v3156_v11 }
 0xd14   :  { %v2012_v36 = vpop.xlane.xlu0 %2011 }
 0xd15   :  { %3157 = vlog2.f32 %v2012_v36 }
 0xd18   :  { %v2014_v32 = vpop.xlane.xlu1 %2013 }
 0xd19   :  { %3159 = vlog2.f32 %v2014_v32  ;;  %v2028_v33 = vpop.xlane.xlu0 %2027  ;;  %v2080_v32 = vsub.f32 %v3822_v27, %v3924_v28 }
 0xd1a   :  { %3161 = vlog2.f32 %v2028_v33 }
 0xd1c   :  { %v2030_v43 = vpop.xlane.xlu1 %2029 }
 0xd1d   :  { %3163 = vlog2.f32 %v2030_v43  ;;  %v2008_v46 = vpop.xlane.xlu0 %2007  ;;  %v2077_v43 = vsub.f32 %v3831_v54, %v3932_v41 }
 0xd1e   :  { %3165 = vlog2.f32 %v2008_v46 }
 0xd1f   :  { %v3158_v45 = vpop.eup %3157 }
 0xd20   :  { %v2044_v51 = vmul.f32 0.6931472, %v3158_v45  ;;  %v2010_v52 = vpop.xlane.xlu1 %2009 }
 0xd21   :  { %v2024_v53 = vpop.xlane.xlu0 %2023  ;;  %3167 = vlog2.f32 %v2010_v52  ;;  %v2075_v52 = vsub.f32 %v3843_v49, %v3939_v26 }
 0xd22   :  { %v2089_v55 = vsub.f32 %v2073_v48, %v2044_v51  ;;  %3169 = vlog2.f32 %v2024_v53  ;;  %v2078_v51 = vsub.f32 %v3834_v34, %v3930_v37  ;;  %v2083_v34 = vsub.f32 %v3858_v56, %v3947_v7 }
 0xd23   :  { %v3160_v44 = vpop.eup %3159  ;;  %v2086_v56 = vsub.f32 %v3879_v1, %v3953_v6 }
 0xd24   :  { %v3162_v62 = vpop.eup %3161  ;;  %v2046_v2 = vmul.f32 0.6931472, %v3160_v44  ;;  %2105 = vst [vmem:[#allocation10 + $0x10] sm:$0xff] %v2089_v55  ;;  %v2026_v63 = vpop.xlane.xlu1 %2025 }
 0xd25   :  { %v2060_v8 = vmul.f32 0.6931472, %v3162_v62  ;;  %v2020_v14 = vpop.xlane.xlu0 %2019  ;;  %3171 = vlog2.f32 %v2026_v63  ;;  %v2076_v62 = vsub.f32 %v3846_v50, %v3937_v47 }
 0xd26   :  { %v2090_v39 = vsub.f32 %v2074_v0, %v2046_v2  ;;  %3173 = vlog2.f32 %v2020_v14  ;;  %v2085_v14 = vsub.f32 %v3876_v4, %v3955_v13 }
 0xd27   :  { %v3164_v61 = vpop.eup %3163  ;;  %v2097_v17 = vsub.f32 %v2081_v57, %v2060_v8  ;;  %v2084_v8 = vsub.f32 %v3861_v3, %v3945_v5 }
 0xd28   :  { %v3166_v58 = vpop.eup %3165  ;;  %2106 = vst [vmem:[#allocation10 + $0x18] sm:$0xff] %v2090_v39  ;;  %v2062_v18 = vmul.f32 0.6931472, %v3164_v61  ;;  %v2022_v60 = vpop.xlane.xlu1 %2021 }
 0xd29   :  { %2113 = vst [vmem:[#allocation10 + $0x50] sm:$0xff] %v2097_v17  ;;  %v2040_v19 = vmul.f32 0.6931472, %v3166_v58  ;;  %v2016_v9 = vpop.xlane.xlu0 %2015  ;;  %3175 = vlog2.f32 %v2022_v60 }
 0xd2a   :  { %v2098_v20 = vsub.f32 %v2082_v59, %v2062_v18  ;;  %3177 = vlog2.f32 %v2016_v9 }
 0xd2b   :  { %v2087_v38 = vsub.f32 %v2071_v25, %v2040_v19  ;;  %v3168_v21 = vpop.eup %3167 }
 0xd2c   :  { %2114 = vst [vmem:[#allocation10 + $0x58] sm:$0xff] %v2098_v20  ;;  %v3170_v23 = vpop.eup %3169  ;;  %v2042_v35 = vmul.f32 0.6931472, %v3168_v21  ;;  %v2018_v15 = vpop.xlane.xlu1 %2017 }
 0xd2d   :  { %2103 = vst [vmem:[#allocation10] sm:$0xff] %v2087_v38  ;;  %v2032_v42 = vpop.xlane.xlu0 %2031  ;;  %v2056_v12 = vmul.f32 0.6931472, %v3170_v23  ;;  %3179 = vlog2.f32 %v2018_v15 }
 0xd2e   :  { %v2088_v10 = vsub.f32 %v2072_v29, %v2042_v35  ;;  %3181 = vlog2.f32 %v2032_v42 }
 0xd2f   :  { %v3172_v30 = vpop.eup %3171  ;;  %v2095_v11 = vsub.f32 %v2079_v24, %v2056_v12 }
 0xd30   :  { %v3174_v36 = vpop.eup %3173  ;;  %2104 = vst [vmem:[#allocation10 + $0x8] sm:$0xff] %v2088_v10  ;;  %v2058_v33 = vmul.f32 0.6931472, %v3172_v30  ;;  %v2034_v40 = vpop.xlane.xlu1 %2033 }
 0xd31   :  { %v2036_v22 = vpop.xlane.xlu0 %2035  ;;  %2111 = vst [vmem:[#allocation10 + $0x40] sm:$0xff] %v2095_v11  ;;  %v2052_v46 = vmul.f32 0.6931472, %v3174_v36  ;;  %3183 = vlog2.f32 %v2034_v40 }
 0xd32   :  { %v2096_v31 = vsub.f32 %v2080_v32, %v2058_v33  ;;  %3185 = vlog2.f32 %v2036_v22 }
 0xd33   :  { %v3176_v16 = vpop.eup %3175  ;;  %v2093_v45 = vsub.f32 %v2077_v43, %v2052_v46 }
 0xd34   :  { %v3178_v48 = vpop.eup %3177  ;;  %2112 = vst [vmem:[#allocation10 + $0x48] sm:$0xff] %v2096_v31  ;;  %v2054_v27 = vmul.f32 0.6931472, %v3176_v16  ;;  %v2038_v28 = vpop.xlane.xlu1 %2037 }
 0xd35   :  { %2109 = vst [vmem:[#allocation10 + $0x30] sm:$0xff] %v2093_v45  ;;  %v2048_v53 = vmul.f32 0.6931472, %v3178_v48  ;;  %3187 = vlog2.f32 %v2038_v28 }
 0xd36   :  { %v2094_v54 = vsub.f32 %v2078_v51, %v2054_v27 }
 0xd37   :  { %v3180_v41 = vpop.eup %3179  ;;  %v2091_v44 = vsub.f32 %v2075_v52, %v2048_v53 }
 0xd38   :  { %v3182_v55 = vpop.eup %3181  ;;  %2110 = vst [vmem:[#allocation10 + $0x38] sm:$0xff] %v2094_v54  ;;  %v2050_v0 = vmul.f32 0.6931472, %v3180_v41 }
 0xd39   :  { %2107 = vst [vmem:[#allocation10 + $0x20] sm:$0xff] %v2091_v44  ;;  %v2064_v37 = vmul.f32 0.6931472, %v3182_v55 }
 0xd3a   :  { %v2092_v2 = vsub.f32 %v2076_v62, %v2050_v0 }
 0xd3b   :  { %v3184_v57 = vpop.eup %3183  ;;  %v2099_v49 = vsub.f32 %v2083_v34, %v2064_v37 }
 0xd3c   :  { %v3186_v26 = vpop.eup %3185  ;;  %2108 = vst [vmem:[#allocation10 + $0x28] sm:$0xff] %v2092_v2  ;;  %v2066_v63 = vmul.f32 0.6931472, %v3184_v57 }
 0xd3d   :  { %2115 = vst [vmem:[#allocation10 + $0x60] sm:$0xff] %v2099_v49  ;;  %v2068_v50 = vmul.f32 0.6931472, %v3186_v26 }
 0xd3e   :  { %v2100_v47 = vsub.f32 %v2084_v8, %v2066_v63 }
 0xd3f   :  { %v3188_v39 = vpop.eup %3187  ;;  %v2101_v61 = vsub.f32 %v2085_v14, %v2068_v50 }
 0xd40   :  { %2116 = vst [vmem:[#allocation10 + $0x68] sm:$0xff] %v2100_v47  ;;  %v2070_v7 = vmul.f32 0.6931472, %v3188_v39 }
 0xd41   :  { %2117 = vst [vmem:[#allocation10 + $0x70] sm:$0xff] %v2101_v61 }
 0xd42   :  { %v2102_v17 = vsub.f32 %v2086_v56, %v2070_v7 }
 0xd44   :  { %2118 = vst [vmem:[#allocation10 + $0x78] sm:$0xff] %v2102_v17 }
 0xd45   :  { %3296 = shalt.err (!%p3293_p8)
}
 0xd46   :  { %s3297_s30 = scalar_lea.hbm %s4014_s6, 2048 }
 0xd47   :  { %p3298_p9 = scmp.ne.s32.totalorder %s4014_s6, %s3297_s30  ;;  %p3301_p10 = scmp.lt.u32.totalorder %s3297_s30, %s4014_s6 }
 0xd49   :  { %p3303_p11 = pnand %p3301_p10, %p3298_p9 }
 0xd4b   :  { %3306 = shalt.err (!%p3303_p11)
}
 0xd4c   :  { %2130 = dma.vmem_to_hbm [thread:$0]  %s2125_s26, 2048, %s4014_s6, [#allocation4], %s3317_s9, %s3317_s9, %s3318_s10  }
 0xd4d   :  { %3313 = dma.done.wait [#allocation4], 2048  }
 0xd4e   :  { %3314 = vsyncadd [#allocation4], 4294965248 }
 0xd4f   :  { %2134 = vsyncpa [#allocation3], 1 }
 0xd50   :  { %2135 = vsyncpa [#allocation6], 1 }
 0xd51   :  { %2136 = vsyncpa [#allocation9], 1 }
 0xd52   :  { %2137 = vsyncpa [#allocation4], 1 }

</bundles_post_ra>
